<compile_context>
chip_gen: v5e
topology: v5e:2x2
jax: 0.10.0
libtpu: 0.0.40
codegen_flags: <defaults>
</compile_context>

<pallas_src>
import math
import functools

import jax
import jax.numpy as jnp
from jax import lax
from jax.experimental import pallas as pl
from jax.experimental.pallas import tpu as pltpu


def _csp_padding(h, w, kh, kw, sh, sw):
    """Same-style asymmetric padding used by CSP.forward (PyTorch F.pad order)."""
    pad_w = max((math.ceil(w / sw) - 1) * sw - w + kw, 0)
    pad_h = max((math.ceil(h / sh) - 1) * sh - h + kh, 0)
    return (pad_h // 2, pad_h - pad_h // 2), (pad_w // 2, pad_w - pad_w // 2)


def _dscb_kernel(x_ref, wd_ref, wp_ref, b_ref, o_ref, yflat_ref, *, C, H, W, KH, KW):
    # x_ref    : (1, C, Hp, Wp)    zero-padded input tile, one batch element (VMEM)
    # wd_ref   : (KH*KW, C, 1, 1)  depthwise weights, tap-major
    # wp_ref   : (COUT, C)         pointwise weights with BN scale folded in
    # b_ref    : (COUT, 1)         pointwise bias + BN shift (column vector)
    # o_ref    : (1, COUT, H*W)    output tile (NCHW with spatial flattened)
    # yflat_ref: (C, H*W) f32      scratch: depthwise result, spatial on lanes
    xp = x_ref[0]  # (C, Hp, Wp)

    # --- depthwise 3x3, stride 1: 9 per-channel multiply-adds on the VPU -------
    acc = jnp.zeros((C, H, W), dtype=jnp.float32)
    for kh in range(KH):
        for kw in range(KW):
            patch = lax.slice(xp, (0, kh, kw), (C, kh + H, kw + W))   # (C, H, W)
            w_tap = wd_ref[kh * KW + kw]                              # (C, 1, 1)
            acc = acc + patch.astype(jnp.float32) * w_tap.astype(jnp.float32)

    # --- flatten spatial onto the lane axis: (C, H, W) -> (C, H*W) -------------
    # Static row-wise stores into VMEM scratch (no minor-dim reshape needed).
    for h in range(H):
        yflat_ref[:, pl.ds(h * W, W)] = acc[:, h, :]

    # --- pointwise 1x1 (+ folded BatchNorm): one lane-dense MXU matmul ---------
    z = jnp.dot(wp_ref[...].astype(jnp.float32), yflat_ref[...],
                preferred_element_type=jnp.float32)                   # (COUT, H*W)
    z = z + b_ref[...].astype(jnp.float32)                            # column bcast
    o_ref[0] = z.astype(o_ref.dtype)


def dscb_forward(x, dw_weight, pw_weight, pw_bias,
                 bn_gamma, bn_beta, bn_mean, bn_var, eps=1e-3):
    """Pallas implementation of DSCB.forward (BatchNorm in inference form).

    x         : (N, C, H, W)
    dw_weight : (C, 1, KH, KW)     depthwise Conv2d weight (groups=C, no bias)
    pw_weight : (COUT, C, 1, 1)    pointwise Conv2d weight
    pw_bias   : (COUT,)
    bn_*      : (COUT,)            BatchNorm2d gamma / beta / running stats
    returns   : (N, COUT, H, W)
    """
    N, C, H, W = x.shape
    COUT = pw_weight.shape[0]
    KH, KW = dw_weight.shape[-2:]

    # CSP "same" padding for the 3x3 stride-1 depthwise (pointwise 1x1 pads 0).
    (ph0, ph1), (pw0, pw1) = _csp_padding(H, W, KH, KW, 1, 1)
    HP, WP = H + ph0 + ph1, W + pw0 + pw1
    HO, WO = H, W  # stride 1

    # Fold inference-mode BatchNorm into the pointwise conv (tiny wrapper math).
    # TODO(synk): training-mode BatchNorm (batch statistics + running-stat
    # updates) is not computed in-kernel; the inference form is used.
    scale = bn_gamma / jnp.sqrt(bn_var + eps)                            # (COUT,)
    wp_eff = pw_weight.reshape(COUT, C) * scale[:, None]                 # (COUT, C)
    b_eff = (scale * (pw_bias - bn_mean) + bn_beta).reshape(COUT, 1)     # (COUT, 1)

    # Depthwise weights tap-major, pre-shaped for per-channel broadcast.
    wd_taps = jnp.transpose(dw_weight.reshape(C, KH * KW), (1, 0)).reshape(
        KH * KW, C, 1, 1)

    # Only remaining wrapper array op: a tiny zero-pad, still NCHW (no relayout).
    x_pad = jnp.pad(x, ((0, 0), (0, 0), (ph0, ph1), (pw0, pw1)))

    kernel = functools.partial(_dscb_kernel, C=C, H=HO, W=WO, KH=KH, KW=KW)

    out_flat = pl.pallas_call(
        kernel,
        out_shape=jax.ShapeDtypeStruct((N, COUT, HO * WO), x.dtype),
        grid_spec=pltpu.PrefetchScalarGridSpec(
            num_scalar_prefetch=0,
            grid=(N,),
            in_specs=[
                pl.BlockSpec((1, C, HP, WP), lambda n: (n, 0, 0, 0)),
                pl.BlockSpec((KH * KW, C, 1, 1), lambda n: (0, 0, 0, 0)),
                pl.BlockSpec((COUT, C), lambda n: (0, 0)),
                pl.BlockSpec((COUT, 1), lambda n: (0, 0)),
            ],
            out_specs=pl.BlockSpec((1, COUT, HO * WO), lambda n: (n, 0, 0)),
            scratch_shapes=[pltpu.VMEM((C, HO * WO), jnp.float32)],
        ),
        # grid=(N,) parallel -> one image per TensorCore on v7x.
        # NOTE: for larger H/W/C, add spatial tiling (with KH-1 halo) and set
        # vmem_limit_bytes explicitly (v7x has only 64 MiB physical VMEM).
        compiler_params=pltpu.CompilerParams(dimension_semantics=("parallel",)),
    )(x_pad, wd_taps, wp_eff, b_eff)

    # Free reshape back to NCHW spatial (contiguous, no data movement).
    return out_flat.reshape(N, COUT, HO, WO)


if __name__ == "__main__":
    # Small shapes consistent with DSCB: batch=2, in_ch=4, out_ch=8, 16x16 spatial.
    N, CIN, H, W = 2, 4, 16, 16
    COUT, KH, KW = 8, 3, 3
    EPS = 1e-3

    key = jax.random.PRNGKey(0)
    kx, kdw, kpw, kpb, kg, kb, km, kv = jax.random.split(key, 8)

    x = jax.random.normal(kx, (N, CIN, H, W), dtype=jnp.float32)

    # Conv2d-like deterministic init (uniform in +/- 1/sqrt(fan_in)).
    bound_dw = 1.0 / math.sqrt(1 * KH * KW)      # depthwise fan_in = 1*3*3
    dw_weight = jax.random.uniform(kdw, (CIN, 1, KH, KW), jnp.float32,
                                   -bound_dw, bound_dw)
    bound_pw = 1.0 / math.sqrt(CIN)              # pointwise fan_in = CIN*1*1
    pw_weight = jax.random.uniform(kpw, (COUT, CIN, 1, 1), jnp.float32,
                                   -bound_pw, bound_pw)
    pw_bias = jax.random.uniform(kpb, (COUT,), jnp.float32, -bound_pw, bound_pw)

    # Non-trivial BatchNorm parameters / running stats (inference form).
    bn_gamma = jax.random.uniform(kg, (COUT,), jnp.float32, 0.5, 1.5)
    bn_beta = 0.1 * jax.random.normal(kb, (COUT,), jnp.float32)
    bn_mean = 0.1 * jax.random.normal(km, (COUT,), jnp.float32)
    bn_var = jax.random.uniform(kv, (COUT,), jnp.float32, 0.5, 1.5)

    out = dscb_forward(x, dw_weight, pw_weight, pw_bias,
                       bn_gamma, bn_beta, bn_mean, bn_var, eps=EPS)
    out = jax.block_until_ready(out)

    # ---- reference: lax depthwise conv -> 1x1 conv + bias -> BN affine --------
    (ph0, ph1), (pw0, pw1) = _csp_padding(H, W, KH, KW, 1, 1)
    y_ref = lax.conv_general_dilated(
        x, dw_weight, window_strides=(1, 1), padding=((ph0, ph1), (pw0, pw1)),
        dimension_numbers=("NCHW", "OIHW", "NCHW"), feature_group_count=CIN)
    z_ref = lax.conv_general_dilated(
        y_ref, pw_weight, window_strides=(1, 1), padding=((0, 0), (0, 0)),
        dimension_numbers=("NCHW", "OIHW", "NCHW")) + pw_bias.reshape(1, COUT, 1, 1)
    inv = (bn_gamma / jnp.sqrt(bn_var + EPS)).reshape(1, COUT, 1, 1)
    ref = (z_ref - bn_mean.reshape(1, COUT, 1, 1)) * inv + bn_beta.reshape(1, COUT, 1, 1)

    assert out.shape == (N, COUT, H, W)
    assert jnp.allclose(out, ref, atol=1e-4, rtol=1e-4), "mismatch vs lax reference"

    print("KERNEL_OK")
</pallas_src>

<mosaic_0001>
module attributes {stable_mosaic.version = 11 : i64} {
  func.func @_dscb_kernel(%arg0: i32, %arg1: memref<1x4x18x18xf32, #tpu.memory_space<vmem>>, %arg2: memref<9x4x1x1xf32, #tpu.memory_space<vmem>>, %arg3: memref<8x4xf32, #tpu.memory_space<vmem>>, %arg4: memref<8x1xf32, #tpu.memory_space<vmem>>, %arg5: memref<1x8x256xf32, #tpu.memory_space<vmem>>, %arg6: memref<4x256xf32, #tpu.memory_space<vmem>>) attributes {dimension_semantics = [#tpu.dimension_semantics<parallel>], iteration_bounds = array<i64: 2>, scalar_prefetch = 0 : i64, scratch_operands = 1 : i64, tpu.core_type = #tpu.core_type<tc>, window_params = [{transform_indices = @transform_0, window_bounds = array<i64: 1, 4, 18, 18>}, {pipeline_mode = #tpu.pipeline_mode<synchronous>, transform_indices = @transform_1, window_bounds = array<i64: 9, 4, 1, 1>}, {pipeline_mode = #tpu.pipeline_mode<synchronous>, transform_indices = @transform_2, window_bounds = array<i64: 8, 4>}, {pipeline_mode = #tpu.pipeline_mode<synchronous>, transform_indices = @transform_3, window_bounds = array<i64: 8, 1>}, {transform_indices = @transform_4, window_bounds = array<i64: 1, 8, 256>}]} {
    %c0 = arith.constant 0 : index
    %c0_0 = arith.constant 0 : index
    %c0_1 = arith.constant 0 : index
    %c0_2 = arith.constant 0 : index
    %0 = vector.load %arg1[%c0, %c0_0, %c0_1, %c0_2] : memref<1x4x18x18xf32, #tpu.memory_space<vmem>>, vector<1x4x18x18xf32>
    %1 = vector.shape_cast %0 : vector<1x4x18x18xf32> to vector<4x18x18xf32>
    %cst = arith.constant 0.000000e+00 : f32
    %2 = vector.broadcast %cst : f32 to vector<4x16x16xf32>
    %3 = vector.extract_strided_slice %1 {offsets = [0, 0, 0], sizes = [4, 16, 16], strides = [1, 1, 1]} : vector<4x18x18xf32> to vector<4x16x16xf32>
    %c0_3 = arith.constant 0 : index
    %c0_4 = arith.constant 0 : index
    %c0_5 = arith.constant 0 : index
    %c0_6 = arith.constant 0 : index
    %4 = vector.load %arg2[%c0_3, %c0_4, %c0_5, %c0_6] : memref<9x4x1x1xf32, #tpu.memory_space<vmem>>, vector<1x4x1x1xf32>
    %5 = vector.shape_cast %4 : vector<1x4x1x1xf32> to vector<4x1x1xf32>
    %6 = vector.broadcast %5 : vector<4x1x1xf32> to vector<4x16x16xf32>
    %7 = arith.mulf %3, %6 : vector<4x16x16xf32>
    %8 = arith.addf %2, %7 : vector<4x16x16xf32>
    %9 = vector.extract_strided_slice %1 {offsets = [0, 0, 1], sizes = [4, 16, 16], strides = [1, 1, 1]} : vector<4x18x18xf32> to vector<4x16x16xf32>
    %c1 = arith.constant 1 : index
    %c0_7 = arith.constant 0 : index
    %c0_8 = arith.constant 0 : index
    %c0_9 = arith.constant 0 : index
    %10 = vector.load %arg2[%c1, %c0_7, %c0_8, %c0_9] : memref<9x4x1x1xf32, #tpu.memory_space<vmem>>, vector<1x4x1x1xf32>
    %11 = vector.shape_cast %10 : vector<1x4x1x1xf32> to vector<4x1x1xf32>
    %12 = vector.broadcast %11 : vector<4x1x1xf32> to vector<4x16x16xf32>
    %13 = arith.mulf %9, %12 : vector<4x16x16xf32>
    %14 = arith.addf %8, %13 : vector<4x16x16xf32>
    %15 = vector.extract_strided_slice %1 {offsets = [0, 0, 2], sizes = [4, 16, 16], strides = [1, 1, 1]} : vector<4x18x18xf32> to vector<4x16x16xf32>
    %c2 = arith.constant 2 : index
    %c0_10 = arith.constant 0 : index
    %c0_11 = arith.constant 0 : index
    %c0_12 = arith.constant 0 : index
    %16 = vector.load %arg2[%c2, %c0_10, %c0_11, %c0_12] : memref<9x4x1x1xf32, #tpu.memory_space<vmem>>, vector<1x4x1x1xf32>
    %17 = vector.shape_cast %16 : vector<1x4x1x1xf32> to vector<4x1x1xf32>
    %18 = vector.broadcast %17 : vector<4x1x1xf32> to vector<4x16x16xf32>
    %19 = arith.mulf %15, %18 : vector<4x16x16xf32>
    %20 = arith.addf %14, %19 : vector<4x16x16xf32>
    %21 = vector.extract_strided_slice %1 {offsets = [0, 1, 0], sizes = [4, 16, 16], strides = [1, 1, 1]} : vector<4x18x18xf32> to vector<4x16x16xf32>
    %c3 = arith.constant 3 : index
    %c0_13 = arith.constant 0 : index
    %c0_14 = arith.constant 0 : index
    %c0_15 = arith.constant 0 : index
    %22 = vector.load %arg2[%c3, %c0_13, %c0_14, %c0_15] : memref<9x4x1x1xf32, #tpu.memory_space<vmem>>, vector<1x4x1x1xf32>
    %23 = vector.shape_cast %22 : vector<1x4x1x1xf32> to vector<4x1x1xf32>
    %24 = vector.broadcast %23 : vector<4x1x1xf32> to vector<4x16x16xf32>
    %25 = arith.mulf %21, %24 : vector<4x16x16xf32>
    %26 = arith.addf %20, %25 : vector<4x16x16xf32>
    %27 = vector.extract_strided_slice %1 {offsets = [0, 1, 1], sizes = [4, 16, 16], strides = [1, 1, 1]} : vector<4x18x18xf32> to vector<4x16x16xf32>
    %c4 = arith.constant 4 : index
    %c0_16 = arith.constant 0 : index
    %c0_17 = arith.constant 0 : index
    %c0_18 = arith.constant 0 : index
    %28 = vector.load %arg2[%c4, %c0_16, %c0_17, %c0_18] : memref<9x4x1x1xf32, #tpu.memory_space<vmem>>, vector<1x4x1x1xf32>
    %29 = vector.shape_cast %28 : vector<1x4x1x1xf32> to vector<4x1x1xf32>
    %30 = vector.broadcast %29 : vector<4x1x1xf32> to vector<4x16x16xf32>
    %31 = arith.mulf %27, %30 : vector<4x16x16xf32>
    %32 = arith.addf %26, %31 : vector<4x16x16xf32>
    %33 = vector.extract_strided_slice %1 {offsets = [0, 1, 2], sizes = [4, 16, 16], strides = [1, 1, 1]} : vector<4x18x18xf32> to vector<4x16x16xf32>
    %c5 = arith.constant 5 : index
    %c0_19 = arith.constant 0 : index
    %c0_20 = arith.constant 0 : index
    %c0_21 = arith.constant 0 : index
    %34 = vector.load %arg2[%c5, %c0_19, %c0_20, %c0_21] : memref<9x4x1x1xf32, #tpu.memory_space<vmem>>, vector<1x4x1x1xf32>
    %35 = vector.shape_cast %34 : vector<1x4x1x1xf32> to vector<4x1x1xf32>
    %36 = vector.broadcast %35 : vector<4x1x1xf32> to vector<4x16x16xf32>
    %37 = arith.mulf %33, %36 : vector<4x16x16xf32>
    %38 = arith.addf %32, %37 : vector<4x16x16xf32>
    %39 = vector.extract_strided_slice %1 {offsets = [0, 2, 0], sizes = [4, 16, 16], strides = [1, 1, 1]} : vector<4x18x18xf32> to vector<4x16x16xf32>
    %c6 = arith.constant 6 : index
    %c0_22 = arith.constant 0 : index
    %c0_23 = arith.constant 0 : index
    %c0_24 = arith.constant 0 : index
    %40 = vector.load %arg2[%c6, %c0_22, %c0_23, %c0_24] : memref<9x4x1x1xf32, #tpu.memory_space<vmem>>, vector<1x4x1x1xf32>
    %41 = vector.shape_cast %40 : vector<1x4x1x1xf32> to vector<4x1x1xf32>
    %42 = vector.broadcast %41 : vector<4x1x1xf32> to vector<4x16x16xf32>
    %43 = arith.mulf %39, %42 : vector<4x16x16xf32>
    %44 = arith.addf %38, %43 : vector<4x16x16xf32>
    %45 = vector.extract_strided_slice %1 {offsets = [0, 2, 1], sizes = [4, 16, 16], strides = [1, 1, 1]} : vector<4x18x18xf32> to vector<4x16x16xf32>
    %c7 = arith.constant 7 : index
    %c0_25 = arith.constant 0 : index
    %c0_26 = arith.constant 0 : index
    %c0_27 = arith.constant 0 : index
    %46 = vector.load %arg2[%c7, %c0_25, %c0_26, %c0_27] : memref<9x4x1x1xf32, #tpu.memory_space<vmem>>, vector<1x4x1x1xf32>
    %47 = vector.shape_cast %46 : vector<1x4x1x1xf32> to vector<4x1x1xf32>
    %48 = vector.broadcast %47 : vector<4x1x1xf32> to vector<4x16x16xf32>
    %49 = arith.mulf %45, %48 : vector<4x16x16xf32>
    %50 = arith.addf %44, %49 : vector<4x16x16xf32>
    %51 = vector.extract_strided_slice %1 {offsets = [0, 2, 2], sizes = [4, 16, 16], strides = [1, 1, 1]} : vector<4x18x18xf32> to vector<4x16x16xf32>
    %c8 = arith.constant 8 : index
    %c0_28 = arith.constant 0 : index
    %c0_29 = arith.constant 0 : index
    %c0_30 = arith.constant 0 : index
    %52 = vector.load %arg2[%c8, %c0_28, %c0_29, %c0_30] : memref<9x4x1x1xf32, #tpu.memory_space<vmem>>, vector<1x4x1x1xf32>
    %53 = vector.shape_cast %52 : vector<1x4x1x1xf32> to vector<4x1x1xf32>
    %54 = vector.broadcast %53 : vector<4x1x1xf32> to vector<4x16x16xf32>
    %55 = arith.mulf %51, %54 : vector<4x16x16xf32>
    %56 = arith.addf %50, %55 : vector<4x16x16xf32>
    %57 = vector.extract_strided_slice %56 {offsets = [0, 0, 0], sizes = [4, 1, 16], strides = [1, 1, 1]} : vector<4x16x16xf32> to vector<4x1x16xf32>
    %58 = vector.shape_cast %57 : vector<4x1x16xf32> to vector<4x16xf32>
    %c0_31 = arith.constant 0 : index
    %c0_32 = arith.constant 0 : index
    %59 = vector.load %arg6[%c0_31, %c0_32] : memref<4x256xf32, #tpu.memory_space<vmem>>, vector<4x16xf32>
    tpu.vector_store %arg6[%c0_31, %c0_32], %58 {strides = array<i32>} : memref<4x256xf32, #tpu.memory_space<vmem>>, vector<4x16xf32>,
    %60 = vector.extract_strided_slice %56 {offsets = [0, 1, 0], sizes = [4, 1, 16], strides = [1, 1, 1]} : vector<4x16x16xf32> to vector<4x1x16xf32>
    %61 = vector.shape_cast %60 : vector<4x1x16xf32> to vector<4x16xf32>
    %c0_33 = arith.constant 0 : index
    %c16 = arith.constant 16 : index
    %62 = vector.load %arg6[%c0_33, %c16] : memref<4x256xf32, #tpu.memory_space<vmem>>, vector<4x16xf32>
    tpu.vector_store %arg6[%c0_33, %c16], %61 {strides = array<i32>} : memref<4x256xf32, #tpu.memory_space<vmem>>, vector<4x16xf32>,
    %63 = vector.extract_strided_slice %56 {offsets = [0, 2, 0], sizes = [4, 1, 16], strides = [1, 1, 1]} : vector<4x16x16xf32> to vector<4x1x16xf32>
    %64 = vector.shape_cast %63 : vector<4x1x16xf32> to vector<4x16xf32>
    %c0_34 = arith.constant 0 : index
    %c32 = arith.constant 32 : index
    %65 = vector.load %arg6[%c0_34, %c32] : memref<4x256xf32, #tpu.memory_space<vmem>>, vector<4x16xf32>
    tpu.vector_store %arg6[%c0_34, %c32], %64 {strides = array<i32>} : memref<4x256xf32, #tpu.memory_space<vmem>>, vector<4x16xf32>,
    %66 = vector.extract_strided_slice %56 {offsets = [0, 3, 0], sizes = [4, 1, 16], strides = [1, 1, 1]} : vector<4x16x16xf32> to vector<4x1x16xf32>
    %67 = vector.shape_cast %66 : vector<4x1x16xf32> to vector<4x16xf32>
    %c0_35 = arith.constant 0 : index
    %c48 = arith.constant 48 : index
    %68 = vector.load %arg6[%c0_35, %c48] : memref<4x256xf32, #tpu.memory_space<vmem>>, vector<4x16xf32>
    tpu.vector_store %arg6[%c0_35, %c48], %67 {strides = array<i32>} : memref<4x256xf32, #tpu.memory_space<vmem>>, vector<4x16xf32>,
    %69 = vector.extract_strided_slice %56 {offsets = [0, 4, 0], sizes = [4, 1, 16], strides = [1, 1, 1]} : vector<4x16x16xf32> to vector<4x1x16xf32>
    %70 = vector.shape_cast %69 : vector<4x1x16xf32> to vector<4x16xf32>
    %c0_36 = arith.constant 0 : index
    %c64 = arith.constant 64 : index
    %71 = vector.load %arg6[%c0_36, %c64] : memref<4x256xf32, #tpu.memory_space<vmem>>, vector<4x16xf32>
    tpu.vector_store %arg6[%c0_36, %c64], %70 {strides = array<i32>} : memref<4x256xf32, #tpu.memory_space<vmem>>, vector<4x16xf32>,
    %72 = vector.extract_strided_slice %56 {offsets = [0, 5, 0], sizes = [4, 1, 16], strides = [1, 1, 1]} : vector<4x16x16xf32> to vector<4x1x16xf32>
    %73 = vector.shape_cast %72 : vector<4x1x16xf32> to vector<4x16xf32>
    %c0_37 = arith.constant 0 : index
    %c80 = arith.constant 80 : index
    %74 = vector.load %arg6[%c0_37, %c80] : memref<4x256xf32, #tpu.memory_space<vmem>>, vector<4x16xf32>
    tpu.vector_store %arg6[%c0_37, %c80], %73 {strides = array<i32>} : memref<4x256xf32, #tpu.memory_space<vmem>>, vector<4x16xf32>,
    %75 = vector.extract_strided_slice %56 {offsets = [0, 6, 0], sizes = [4, 1, 16], strides = [1, 1, 1]} : vector<4x16x16xf32> to vector<4x1x16xf32>
    %76 = vector.shape_cast %75 : vector<4x1x16xf32> to vector<4x16xf32>
    %c0_38 = arith.constant 0 : index
    %c96 = arith.constant 96 : index
    %77 = vector.load %arg6[%c0_38, %c96] : memref<4x256xf32, #tpu.memory_space<vmem>>, vector<4x16xf32>
    tpu.vector_store %arg6[%c0_38, %c96], %76 {strides = array<i32>} : memref<4x256xf32, #tpu.memory_space<vmem>>, vector<4x16xf32>,
    %78 = vector.extract_strided_slice %56 {offsets = [0, 7, 0], sizes = [4, 1, 16], strides = [1, 1, 1]} : vector<4x16x16xf32> to vector<4x1x16xf32>
    %79 = vector.shape_cast %78 : vector<4x1x16xf32> to vector<4x16xf32>
    %c0_39 = arith.constant 0 : index
    %c112 = arith.constant 112 : index
    %80 = vector.load %arg6[%c0_39, %c112] : memref<4x256xf32, #tpu.memory_space<vmem>>, vector<4x16xf32>
    tpu.vector_store %arg6[%c0_39, %c112], %79 {strides = array<i32>} : memref<4x256xf32, #tpu.memory_space<vmem>>, vector<4x16xf32>,
    %81 = vector.extract_strided_slice %56 {offsets = [0, 8, 0], sizes = [4, 1, 16], strides = [1, 1, 1]} : vector<4x16x16xf32> to vector<4x1x16xf32>
    %82 = vector.shape_cast %81 : vector<4x1x16xf32> to vector<4x16xf32>
    %c0_40 = arith.constant 0 : index
    %c128 = arith.constant 128 : index
    %83 = vector.load %arg6[%c0_40, %c128] : memref<4x256xf32, #tpu.memory_space<vmem>>, vector<4x16xf32>
    tpu.vector_store %arg6[%c0_40, %c128], %82 {strides = array<i32>} : memref<4x256xf32, #tpu.memory_space<vmem>>, vector<4x16xf32>,
    %84 = vector.extract_strided_slice %56 {offsets = [0, 9, 0], sizes = [4, 1, 16], strides = [1, 1, 1]} : vector<4x16x16xf32> to vector<4x1x16xf32>
    %85 = vector.shape_cast %84 : vector<4x1x16xf32> to vector<4x16xf32>
    %c0_41 = arith.constant 0 : index
    %c144 = arith.constant 144 : index
    %86 = vector.load %arg6[%c0_41, %c144] : memref<4x256xf32, #tpu.memory_space<vmem>>, vector<4x16xf32>
    tpu.vector_store %arg6[%c0_41, %c144], %85 {strides = array<i32>} : memref<4x256xf32, #tpu.memory_space<vmem>>, vector<4x16xf32>,
    %87 = vector.extract_strided_slice %56 {offsets = [0, 10, 0], sizes = [4, 1, 16], strides = [1, 1, 1]} : vector<4x16x16xf32> to vector<4x1x16xf32>
    %88 = vector.shape_cast %87 : vector<4x1x16xf32> to vector<4x16xf32>
    %c0_42 = arith.constant 0 : index
    %c160 = arith.constant 160 : index
    %89 = vector.load %arg6[%c0_42, %c160] : memref<4x256xf32, #tpu.memory_space<vmem>>, vector<4x16xf32>
    tpu.vector_store %arg6[%c0_42, %c160], %88 {strides = array<i32>} : memref<4x256xf32, #tpu.memory_space<vmem>>, vector<4x16xf32>,
    %90 = vector.extract_strided_slice %56 {offsets = [0, 11, 0], sizes = [4, 1, 16], strides = [1, 1, 1]} : vector<4x16x16xf32> to vector<4x1x16xf32>
    %91 = vector.shape_cast %90 : vector<4x1x16xf32> to vector<4x16xf32>
    %c0_43 = arith.constant 0 : index
    %c176 = arith.constant 176 : index
    %92 = vector.load %arg6[%c0_43, %c176] : memref<4x256xf32, #tpu.memory_space<vmem>>, vector<4x16xf32>
    tpu.vector_store %arg6[%c0_43, %c176], %91 {strides = array<i32>} : memref<4x256xf32, #tpu.memory_space<vmem>>, vector<4x16xf32>,
    %93 = vector.extract_strided_slice %56 {offsets = [0, 12, 0], sizes = [4, 1, 16], strides = [1, 1, 1]} : vector<4x16x16xf32> to vector<4x1x16xf32>
    %94 = vector.shape_cast %93 : vector<4x1x16xf32> to vector<4x16xf32>
    %c0_44 = arith.constant 0 : index
    %c192 = arith.constant 192 : index
    %95 = vector.load %arg6[%c0_44, %c192] : memref<4x256xf32, #tpu.memory_space<vmem>>, vector<4x16xf32>
    tpu.vector_store %arg6[%c0_44, %c192], %94 {strides = array<i32>} : memref<4x256xf32, #tpu.memory_space<vmem>>, vector<4x16xf32>,
    %96 = vector.extract_strided_slice %56 {offsets = [0, 13, 0], sizes = [4, 1, 16], strides = [1, 1, 1]} : vector<4x16x16xf32> to vector<4x1x16xf32>
    %97 = vector.shape_cast %96 : vector<4x1x16xf32> to vector<4x16xf32>
    %c0_45 = arith.constant 0 : index
    %c208 = arith.constant 208 : index
    %98 = vector.load %arg6[%c0_45, %c208] : memref<4x256xf32, #tpu.memory_space<vmem>>, vector<4x16xf32>
    tpu.vector_store %arg6[%c0_45, %c208], %97 {strides = array<i32>} : memref<4x256xf32, #tpu.memory_space<vmem>>, vector<4x16xf32>,
    %99 = vector.extract_strided_slice %56 {offsets = [0, 14, 0], sizes = [4, 1, 16], strides = [1, 1, 1]} : vector<4x16x16xf32> to vector<4x1x16xf32>
    %100 = vector.shape_cast %99 : vector<4x1x16xf32> to vector<4x16xf32>
    %c0_46 = arith.constant 0 : index
    %c224 = arith.constant 224 : index
    %101 = vector.load %arg6[%c0_46, %c224] : memref<4x256xf32, #tpu.memory_space<vmem>>, vector<4x16xf32>
    tpu.vector_store %arg6[%c0_46, %c224], %100 {strides = array<i32>} : memref<4x256xf32, #tpu.memory_space<vmem>>, vector<4x16xf32>,
    %102 = vector.extract_strided_slice %56 {offsets = [0, 15, 0], sizes = [4, 1, 16], strides = [1, 1, 1]} : vector<4x16x16xf32> to vector<4x1x16xf32>
    %103 = vector.shape_cast %102 : vector<4x1x16xf32> to vector<4x16xf32>
    %c0_47 = arith.constant 0 : index
    %c240 = arith.constant 240 : index
    %104 = vector.load %arg6[%c0_47, %c240] : memref<4x256xf32, #tpu.memory_space<vmem>>, vector<4x16xf32>
    tpu.vector_store %arg6[%c0_47, %c240], %103 {strides = array<i32>} : memref<4x256xf32, #tpu.memory_space<vmem>>, vector<4x16xf32>,
    %c0_48 = arith.constant 0 : index
    %c0_49 = arith.constant 0 : index
    %105 = vector.load %arg3[%c0_48, %c0_49] : memref<8x4xf32, #tpu.memory_space<vmem>>, vector<8x4xf32>
    %c0_50 = arith.constant 0 : index
    %c0_51 = arith.constant 0 : index
    %106 = vector.load %arg6[%c0_50, %c0_51] : memref<4x256xf32, #tpu.memory_space<vmem>>, vector<4x256xf32>
    %cst_52 = arith.constant dense<0.000000e+00> : vector<8x256xf32>
    %107 = tpu.matmul %105, %106, %cst_52 {dimension_numbers = #tpu.dot_dimension_numbers<[1], [0], [0], [1], [0, 0, 1, 1], [], []>} : vector<8x4xf32>, vector<4x256xf32>, vector<8x256xf32> -> vector<8x256xf32>
    %c0_53 = arith.constant 0 : index
    %c0_54 = arith.constant 0 : index
    %108 = vector.load %arg4[%c0_53, %c0_54] : memref<8x1xf32, #tpu.memory_space<vmem>>, vector<8x1xf32>
    %109 = vector.broadcast %108 : vector<8x1xf32> to vector<8x256xf32>
    %110 = arith.addf %107, %109 : vector<8x256xf32>
    %c0_55 = arith.constant 0 : index
    %c0_56 = arith.constant 0 : index
    %c0_57 = arith.constant 0 : index
    %111 = vector.load %arg5[%c0_55, %c0_56, %c0_57] : memref<1x8x256xf32, #tpu.memory_space<vmem>>, vector<1x8x256xf32>
    %112 = vector.shape_cast %111 : vector<1x8x256xf32> to vector<8x256xf32>
    %113 = vector.shape_cast %110 : vector<8x256xf32> to vector<1x8x256xf32>
    tpu.vector_store %arg5[%c0_55, %c0_56, %c0_57], %113 {strides = array<i32>} : memref<1x8x256xf32, #tpu.memory_space<vmem>>, vector<1x8x256xf32>,
    return
  }
  func.func @transform_0(%arg0: i32) -> (i32, i32, i32, i32) {
    %c0_i32 = arith.constant 0 : i32
    %c0_i32_0 = arith.constant 0 : i32
    %c0_i32_1 = arith.constant 0 : i32
    %c0_i32_2 = arith.constant 0 : i32
    return %arg0, %c0_i32, %c0_i32_0, %c0_i32_1 : i32, i32, i32, i32
  }
  func.func @transform_1(%arg0: i32) -> (i32, i32, i32, i32) {
    %c0_i32 = arith.constant 0 : i32
    %c0_i32_0 = arith.constant 0 : i32
    %c0_i32_1 = arith.constant 0 : i32
    %c0_i32_2 = arith.constant 0 : i32
    %c0_i32_3 = arith.constant 0 : i32
    return %c0_i32, %c0_i32_0, %c0_i32_1, %c0_i32_2 : i32, i32, i32, i32
  }
  func.func @transform_2(%arg0: i32) -> (i32, i32) {
    %c0_i32 = arith.constant 0 : i32
    %c0_i32_0 = arith.constant 0 : i32
    %c0_i32_1 = arith.constant 0 : i32
    return %c0_i32, %c0_i32_0 : i32, i32
  }
  func.func @transform_3(%arg0: i32) -> (i32, i32) {
    %c0_i32 = arith.constant 0 : i32
    %c0_i32_0 = arith.constant 0 : i32
    %c0_i32_1 = arith.constant 0 : i32
    return %c0_i32, %c0_i32_0 : i32, i32
  }
  func.func @transform_4(%arg0: i32) -> (i32, i32, i32) {
    %c0_i32 = arith.constant 0 : i32
    %c0_i32_0 = arith.constant 0 : i32
    %c0_i32_1 = arith.constant 0 : i32
    return %arg0, %c0_i32, %c0_i32_0 : i32, i32, i32
  }
}

</mosaic_0001>

<bundles_post_ra>
// kernel: tpu_custom_call.1
= control target key start
LH: loop header
LB: loop body
LE: loop exit
PB: predicated region body
PF: predicated region fallthrough
CT: control target
= control target key end

     0   :  { %9 = vsyncpa [#allocation4], 0  ;;  %s2696_s0 = inlined_call_operand.vmem [shape: f32[2,4,18,18], index: 0, kind: input, shape index: {}]   ;;  %s2697_s1 = inlined_call_operand.vmem [shape: f32[9,4,1,1], index: 1, kind: input, shape index: {}]   ;;  %s2698_s2 = inlined_call_operand.vmem [shape: f32[8,4], index: 2, kind: input, shape index: {}]   ;;  %s2699_s3 = inlined_call_operand.vmem [shape: f32[8,1], index: 3, kind: input, shape index: {}]   ;;  %s2700_s4 = inlined_call_operand.hbm [shape: f32[2,8,256], index: 4, kind: output, shape index: {}]  }
   0x1   :  { %11 = vsyncpa [#allocation4 + $0x1], 0  ;;  %s1703_s15 = smov 0   ;;  %s1705_s16 = smov 0  }
   0x2   :  { %s1707_s17 = smov 0   ;;  %s1709_s18 = smov 0  }
   0x3 LB: > { %s1724_s19 = sadd.s32 4294967295, %s1666_s18   ;;  %s1467_s20 = sadd.s32 4294967294, %s1666_s18   ;;  %s1666_s18 = sphi %s1709_s18, %s2730_s18   ;;  %s1662_s17 = sphi %s1707_s17, %s2729_s17   ;;  %s1658_s16 = sphi %s1705_s16, %s2728_s16   ;;  %s1654_s15 = sphi %s1703_s15, %s2727_s15  }
   0x4   : > { %s1728_s21 = sadd.s32 1, %s1666_s18   ;;  %s113_s22 = sadd.s32 1, %s1662_s17 }
   0x5   : > { %s110_s23 = ssub.s32 %s1666_s18, %s1728_s21  ;;  %p123_p0 = scmp.ne.s32.totalorder %s1662_s17, %s1658_s16 }
   0x6   : > { %p111_p1 = scmp.eq.s32.totalorder %s110_s23, 0  ;;  %p124_p2 = scmp.eq.s32.totalorder %s1724_s19, 1 }
   0x7   : > { %p129_p3 = scmp.ne.s32.totalorder %s1658_s16, %s1654_s15  ;;  %p130_p4 = scmp.eq.s32.totalorder %s1467_s20, 1 }
   0x8   : > { %s1739_s24 = scalar_select %p111_p1, %s1662_s17, %s113_s22  }
   0x9   : > { %p1741_p5 = por %p124_p2, %p123_p0  ;;  %p1745_p6 = por %p130_p4, %p129_p3 }
   0xa   : > { %p1470_p7 = scmp.ge.s32.totalorder %s1666_s18, 1  ;;  %p165_p8 = scmp.lt.s32.totalorder %s1666_s18, 3 }
   0xc   : > { %p166_p9 = pnand %p1470_p7, %p165_p8 }
   0xe   : > { %169 = sbr.rel (%p166_p9) target bundleno = 702 (0x2be), region = 36 }
  0x13   : > { %v1568_v0 = vld [vmem:[%s2697_s1 + $0x4] ss:$0 sm:$0xff]  ;;  %v1668_v1 = vmov 0   ;;  %v1569_v2 = vld [vmem:[%s2697_s1 + $0x2] ss:$0 sm:$0xff]  ;;  %p191_p10 = scmp.lt.s32.totalorder %s1724_s19, 1 }
  0x14   : > { %1567 = vset.pattern.permute.xlu2 %v1668_v1  ;;  %1566 = vset.pattern.permute.xlu1 %v1668_v1  ;;  %v1570_v3 = vld [vmem:[%s2697_s1] ss:$0 sm:$0xff]  ;;  %v1571_v4 = vld [vmem:[%s2697_s1 + $0x5] ss:$0 sm:$0xff]  ;;  %v1572_v5 = vld [vmem:[%s2697_s1 + $0x3] ss:$0 sm:$0xff] }
  0x15   : > { %1565 = vset.pattern.permute.xlu0 %v1668_v1  ;;  %266 = vperm.xlu2 %1567, %v1568_v0   ;;  %v1573_v6 = vld [vmem:[%s2697_s1 + $0x1] ss:$0 sm:$0xff]  ;;  %v1574_v7 = vld [vmem:[%s2697_s1 + $0x8] ss:$0 sm:$0xff]  ;;  %v1575_v8 = vld [vmem:[%s2697_s1 + $0x7] ss:$0 sm:$0xff] }
  0x16   : > { %229 = vperm.xlu1 %1566, %v1569_v2   ;;  %221 = vperm.xlu0 %1565, %v1570_v3   ;;  %v1576_v9 = vld [vmem:[%s2697_s1 + $0x6] ss:$0 sm:$0xff]  ;;  %v1577_v10 = vld [vmem:[%s2697_s1 + $0x11] ss:$0 sm:$0xff]  ;;  %v1578_v11 = vld [vmem:[%s2697_s1 + $0x10] ss:$0 sm:$0xff] }
  0x17   : > { %v1579_v12 = vld [vmem:[%s2697_s1 + $0x9] ss:$0 sm:$0xff]  ;;  %v1580_v13 = vld [vmem:[%s2697_s1 + $0x14] ss:$0 sm:$0xff]  ;;  %v1581_v14 = vld [vmem:[%s2697_s1 + $0x12] ss:$0 sm:$0xff] }
  0x18   : > { %v1582_v15 = vld [vmem:[%s2697_s1 + $0xa] ss:$0 sm:$0xff]  ;;  %v1583_v16 = vld [vmem:[%s2697_s1 + $0xb] ss:$0 sm:$0xff]  ;;  %v1584_v17 = vld [vmem:[%s2697_s1 + $0x16] ss:$0 sm:$0xff] }
  0x19   : > { %v1585_v18 = vld [vmem:[%s2697_s1 + $0x15] ss:$0 sm:$0xff]  ;;  %v1586_v19 = vld [vmem:[%s2697_s1 + $0x1d] ss:$0 sm:$0xff]  ;;  %v1587_v20 = vld [vmem:[%s2697_s1 + $0x1c] ss:$0 sm:$0xff] }
  0x1a   : > { %v1588_v21 = vld [vmem:[%s2697_s1 + $0x13] ss:$0 sm:$0xff]  ;;  %v1589_v22 = vld [vmem:[%s2697_s1 + $0x20] ss:$0 sm:$0xff]  ;;  %v1590_v23 = vld [vmem:[%s2697_s1 + $0x1e] ss:$0 sm:$0xff] }
  0x1b   : > { %v1591_v24 = vld [vmem:[%s2697_s1 + $0x17] ss:$0 sm:$0xff]  ;;  %v1592_v25 = vld [vmem:[%s2697_s1 + $0x1f] ss:$0 sm:$0xff]  ;;  %v1593_v26 = vld [vmem:[%s2697_s1 + $0x22] ss:$0 sm:$0xff] }
  0x1c   : > { %v1594_v27 = vld [vmem:[%s2697_s1 + $0x21] ss:$0 sm:$0xff]  ;;  %v1595_v28 = vld [vmem:[%s2697_s1 + $0xd] ss:$0 sm:$0xff]  ;;  %v1596_v29 = vld [vmem:[%s2697_s1 + $0xc] ss:$0 sm:$0xff] }
  0x1d   : > { %270 = vperm.xlu2 %1567, %v1571_v4   ;;  %v1597_v30 = vld [vmem:[%s2697_s1 + $0x23] ss:$0 sm:$0xff]  ;;  %v1598_v31 = vld [vmem:[%s2697_s1 + $0xf] ss:$0 sm:$0xff]  ;;  %v1599_v32 = vld [vmem:[%s2697_s1 + $0x19] ss:$0 sm:$0xff] }
  0x1e   : > { %233 = vperm.xlu1 %1566, %v1572_v5   ;;  %225 = vperm.xlu0 %1565, %v1573_v6   ;;  %v1600_v33 = vld [vmem:[%s2697_s1 + $0xe] ss:$0 sm:$0xff]  ;;  %s192_s22 = scalar_select %p191_p10, %s1724_s19, 1  ;;  %v1601_v34 = vld [vmem:[%s2697_s1 + $0x1a] ss:$0 sm:$0xff]  ;;  %vm459_vm0 = vcmask 1046528  }
  0x1f   : > { %v1602_v35 = vld [vmem:[%s2697_s1 + $0x18] ss:$0 sm:$0xff]  ;;  %s1669_s8 = smov 127   ;;  %s1670_s9 = smov 126   ;;  %vm759_vm1 = vcmask 1045504   ;;  %vm1011_vm2 = vcmask 1041409  }
  0x20   : > { %s1515_s23 = smul.u32 96, %s192_s22  ;;  %vm1013_vm3 = vcmask 1045509   ;;  %vm1016_vm4 = vcmask 1042434   ;;  %vm1018_vm5 = vcmask 1046534   ;;  %vm1021_vm6 = vcmask 1043459   ;;  %s1671_s12 = smov 32  }
  0x21   : > { %vm1023_vm7 = vcmask 1047559   ;;  %s1672_s13 = smov 16   ;;  %vm1026_vm8 = vcmask 125952   ;;  %s1673_s14 = smov 48   ;;  %vm1040_vm9 = vcmask 257152   ;;  %vm1054_vm10 = vcmask 388352  }
  0x22   : > { %s1861_s7 = scalar_lea.vmem %s2696_s0, %s1515_s23  ;;  %s1674_s20 = smov 80   ;;  %vm1068_vm11 = vcmask 519552   ;;  %vm1094_vm12 = vcmask 650752   ;;  %vm1120_vm13 = vcmask 781952   ;;  %vm1146_vm14 = vcmask 913152  }
  0x23   : > { %v1864_v36 = vld [vmem:[%s1861_s7] sm:$0xff]  ;;  %v1867_v38 = vld [vmem:[%s1861_s7 + $0x8] sm:$0xff]  ;;  %v1873_v41 = vld [vmem:[%s1861_s7 + $0x18] sm:$0xff]  ;;  %s1675_s22 = smov 64   ;;  %s1676_s23 = smov 96   ;;  %vm1172_vm15 = vcmask 1044352  }
  0x24   : > { %v1893_v49 = vld [vmem:[%s1861_s7 + $0x10] sm:$0x3]  ;;  %v1907_v59 = vld [vmem:[%s1861_s7 + $0x48] sm:$0xff]  ;;  %v1924_v3 = vld [vmem:[%s1861_s7 + $0x20] sm:$0xff]  ;;  %s1677_s27 = smov 112   ;;  %s188_s6 = sand.u32 1, %s1658_s16  }
  0x25   : > { %343 = vperm.xlu2 %1567, %v1574_v7   ;;  %v1912_v61 = vld [vmem:[%s1861_s7 + $0x30] sm:$0xff]  ;;  %v1927_v4 = vld [vmem:[%s1861_s7 + $0x28] sm:$0x3]  ;;  %s1624_s28 = scalar_lea.hbm %s2700_s4, 32 }
  0x26   : > { %278 = vperm.xlu1 %1566, %v1575_v8   ;;  %274 = vperm.xlu0 %1565, %v1576_v9  }
  0x2d   : > { %514 = vperm.xlu2 %1567, %v1577_v10  }
  0x2e   : > { %510 = vperm.xlu1 %1566, %v1578_v11   ;;  %347 = vperm.xlu0 %1565, %v1579_v12  }
  0x35   : > { %615 = vperm.xlu2 %1567, %v1580_v13  }
  0x36   : > { %518 = vperm.xlu1 %1566, %v1581_v14   ;;  %351 = vperm.xlu0 %1565, %v1582_v15  }
  0x3d   : > { %355 = vperm.xlu2 %1567, %v1583_v16  }
  0x3e   : > { %623 = vperm.xlu1 %1566, %v1584_v17   ;;  %619 = vperm.xlu0 %1565, %v1585_v18  }
  0x45   : > { %814 = vperm.xlu2 %1567, %v1586_v19  }
  0x46   : > { %810 = vperm.xlu1 %1566, %v1587_v20   ;;  %522 = vperm.xlu0 %1565, %v1588_v21   ;;  %v1947_v20 = vld [vmem:[%s1861_s7 + $0x40] sm:$0x3] }
  0x4d   : > { %915 = vperm.xlu2 %1567, %v1589_v22   ;;  %v1603_v22 = vld [vmem:[%s2697_s1 + $0x1b] ss:$0 sm:$0xff] }
  0x4e   : > { %818 = vperm.xlu1 %1566, %v1590_v23   ;;  %627 = vperm.xlu0 %1565, %v1591_v24  }
  0x55   : > { %822 = vperm.xlu2 %1567, %v1592_v25   ;;  %v1959_v25 = vld [vmem:[%s1861_s7 + $0x38] sm:$0xff] }
  0x56   : > { %923 = vperm.xlu1 %1566, %v1593_v26   ;;  %919 = vperm.xlu0 %1565, %v1594_v27  }
  0x5d   : > { %424 = vperm.xlu2 %1567, %v1595_v28  }
  0x5e   : > { %420 = vperm.xlu1 %1566, %v1596_v29   ;;  %927 = vperm.xlu0 %1565, %v1597_v30  }
  0x65   : > { %432 = vperm.xlu2 %1567, %v1598_v31  }
  0x66   : > { %724 = vperm.xlu1 %1566, %v1599_v32   ;;  %428 = vperm.xlu0 %1565, %v1600_v33  }
  0x6d   : > { %728 = vperm.xlu2 %1567, %v1601_v34  }
  0x6e   : > { %720 = vperm.xlu0 %1565, %v1602_v35  }
  0x6f   : > { %v267_v37 = vpop.permute.xlu2 %266 }
  0x70   : > { %v281_v39 = vmul.f32 %v267_v37, %v1864_v36  ;;  %v282_v40 = vmul.f32 %v267_v37, %v1867_v38 }
  0x75   : > { %297 = vrot.lane.b32.xlu2 %v281_v39, %s1669_s8 }
  0x76   : > { %299 = vrot.lane.b32.xlu0 %v282_v40, %s1669_s8 }
  0x77   : > { %v1876_v42 = vpop.permute.xlu2 %270 }
  0x78   : > { %v283_v43 = vmul.f32 %v1876_v42, %v1873_v41 }
  0x7a   : > { %301 = vrot.lane.b32.xlu1 %v283_v43, %s1669_s8 }
  0x7f   : > { %v1881_v44 = vpop.permute.xlu2 %343 }
  0x80   : > { %v358_v45 = vmul.f32 %v1881_v44, %v1864_v36 }
  0x82   : > { %374 = vrot.lane.b32.xlu2 %v358_v45, %s1670_s9 }
  0x87   : > { %v1886_v46 = vpop.permute.xlu2 %514 }
  0x88   : > { %v1888_v47 = vpop.permute.xlu1 %229  ;;  %v1890_v48 = vpop.permute.xlu0 %221  ;;  %v528_v23 = vmul.f32 %v1886_v46, %v1873_v41  ;;  %v1956_v24 = vmul.f32 %v1886_v46, %v1924_v3 }
  0x8a   : > { %v554_v45 = vrot.slane %v528_v23, 1 }
  0x8f   : > { %v616_v50 = vpop.permute.xlu2 %615 }
  0x90   : > { %v631_v51 = vmul.f32 %v616_v50, %v1867_v38  ;;  %v632_v52 = vmul.f32 %v616_v50, %v1893_v49  ;;  %v1897_v53 = vpop.permute.xlu1 %233  ;;  %v1899_v54 = vpop.permute.xlu0 %225  ;;  %v630_v0 = vmul.f32 %v616_v50, %v1864_v36  ;;  %v2705_v50 = vrot.slane %v1956_v24, 1 }
  0x92   : > { %v655_v55 = vrot.slane %v631_v51, 1  ;;  %v657_v56 = vrot.slane %v632_v52, 1  ;;  %v654_v2 = vrot.slane %v630_v0, 1  ;;  %v1986_v0 = vld [vmem:[%s1861_s7 + $0x50] sm:$0xff] }
  0x94   : > { %v1902_v57 = vsel %vm459_vm0, %v655_v55, %v657_v56  ;;  %v656_v15 = vsel %vm459_vm0, %v654_v2, %v655_v55  ;;  %v1980_v56 = vld [vmem:[%s1861_s7 + $0x58] sm:$0x3]  ;;  %s1471_s7 = sshll.u32 %s188_s6, 4 }
  0x97   : > { %v1904_v58 = vpop.permute.xlu2 %355 }
  0x98   : > { %v1909_v60 = vpop.permute.xlu1 %278  ;;  %v1916_v63 = vpop.permute.xlu0 %274  ;;  %v364_v34 = vmul.f32 %v1904_v58, %v1907_v59 }
  0x99   : > { %v287_v62 = vmul.f32 %v1909_v60, %v1907_v59  ;;  %v285_v1 = vmul.f32 %v1916_v63, %v1912_v61 }
  0x9b   : > { %309 = vrot.lane.b32.xlu2 %v287_v62, %s1669_s8  ;;  %305 = vrot.lane.b32.xlu1 %v285_v1, %s1669_s8 }
  0x9f   : > { %v815_v5 = vpop.permute.xlu2 %814 }
  0xa0   : > { %v829_v6 = vmul.f32 %v815_v5, %v1924_v3  ;;  %v830_v7 = vmul.f32 %v815_v5, %v1927_v4  ;;  %v511_v8 = vpop.permute.xlu1 %510  ;;  %v1933_v11 = vpop.permute.xlu0 %347  ;;  %v828_v29 = vmul.f32 %v815_v5, %v1873_v41 }
  0xa1   : > { %v526_v9 = vmul.f32 %v511_v8, %v1867_v38  ;;  %v527_v10 = vmul.f32 %v511_v8, %v1893_v49  ;;  %v360_v14 = vmul.f32 %v1933_v11, %v1873_v41  ;;  %v525_v30 = vmul.f32 %v511_v8, %v1864_v36 }
  0xa2   : > { %v855_v12 = vrot.slane %v829_v6, 2  ;;  %v857_v13 = vrot.slane %v830_v7, 2  ;;  %v854_v52 = vrot.slane %v828_v29, 2  ;;  %v556_v7 = vsel %vm459_vm0, %v554_v45, %v2705_v50 }
  0xa3   : > { %v550_v16 = vrot.slane %v526_v9, 1  ;;  %v552_v17 = vrot.slane %v527_v10, 1  ;;  %674 = vrot.lane.b32.xlu2 %v656_v15, %s1670_s9  ;;  %378 = vrot.lane.b32.xlu0 %v360_v14, %s1670_s9  ;;  %v549_v55 = vrot.slane %v525_v30, 1 }
  0xa4   : > { %v1941_v18 = vsel %vm759_vm1, %v855_v12, %v857_v13  ;;  %v856_v14 = vsel %vm759_vm1, %v854_v52, %v855_v12 }
  0xa5   : > { %v1944_v19 = vsel %vm459_vm0, %v550_v16, %v552_v17  ;;  %v551_v13 = vsel %vm459_vm0, %v549_v55, %v550_v16 }
  0xa7   : > { %v916_v21 = vpop.permute.xlu2 %915 }
  0xa8   : > { %v931_v26 = vmul.f32 %v916_v21, %v1867_v38  ;;  %v932_v27 = vmul.f32 %v916_v21, %v1893_v49  ;;  %v519_v28 = vpop.permute.xlu1 %518  ;;  %v1967_v33 = vpop.permute.xlu0 %351  ;;  %v930_v15 = vmul.f32 %v916_v21, %v1864_v36 }
  0xa9   : > { %v532_v31 = vmul.f32 %v519_v28, %v1959_v25  ;;  %v533_v32 = vmul.f32 %v519_v28, %v1947_v20  ;;  %v362_v39 = vmul.f32 %v1967_v33, %v1912_v61  ;;  %v531_v17 = vmul.f32 %v519_v28, %v1912_v61 }
  0xaa   : > { %v955_v35 = vrot.slane %v931_v26, 2  ;;  %v957_v37 = vrot.slane %v932_v27, 2  ;;  %v954_v28 = vrot.slane %v930_v15, 2 }
  0xab   : > { %v560_v40 = vrot.slane %v532_v31, 1  ;;  %v562_v43 = vrot.slane %v533_v32, 1  ;;  %732 = vperm.xlu2 %1567, %v1603_v22   ;;  %382 = vrot.lane.b32.xlu1 %v362_v39, %s1670_s9 }
  0xac   : > { %386 = vrot.lane.b32.xlu0 %v364_v34, %s1670_s9  ;;  %v1977_v51 = vsel %vm759_vm1, %v955_v35, %v957_v37  ;;  %v559_v34 = vrot.slane %v531_v17, 1 }
  0xad   : > { %v1983_v62 = vsel %vm459_vm0, %v560_v40, %v562_v43 }
  0xaf   : > { %v823_v1 = vpop.permute.xlu2 %822 }
  0xb0   : > { %v835_v2 = vmul.f32 %v823_v1, %v1986_v0  ;;  %v836_v5 = vmul.f32 %v823_v1, %v1980_v56  ;;  %v624_v6 = vpop.permute.xlu1 %623  ;;  %v620_v10 = vpop.permute.xlu0 %619  ;;  %v834_v52 = vmul.f32 %v823_v1, %v1907_v59 }
  0xb1   : > { %v637_v8 = vmul.f32 %v624_v6, %v1959_v25  ;;  %v638_v9 = vmul.f32 %v624_v6, %v1947_v20  ;;  %v633_v29 = vmul.f32 %v620_v10, %v1873_v41  ;;  %v634_v30 = vmul.f32 %v620_v10, %v1924_v3 }
  0xb2   : > { %v865_v22 = vrot.slane %v835_v2, 2  ;;  %v867_v23 = vrot.slane %v836_v5, 2  ;;  %v635_v31 = vmul.f32 %v620_v10, %v1927_v4  ;;  %v636_v2 = vmul.f32 %v624_v6, %v1912_v61 }
  0xb3   : > { %v665_v26 = vrot.slane %v637_v8, 1  ;;  %v667_v27 = vrot.slane %v638_v9, 1  ;;  %873 = vrot.lane.b32.xlu2 %v856_v14, %s1669_s8  ;;  %573 = vrot.lane.b32.xlu1 %v556_v7, %s1669_s8  ;;  %v660_v16 = vrot.slane %v634_v30, 1  ;;  %v659_v37 = vrot.slane %v633_v29, 1 }
  0xb4   : > { %569 = vrot.lane.b32.xlu0 %v551_v13, %s1669_s8  ;;  %v2006_v12 = vsel %vm759_vm1, %v865_v22, %v867_v23  ;;  %v662_v32 = vrot.slane %v635_v31, 1  ;;  %v956_v5 = vsel %vm759_vm1, %v954_v28, %v955_v35  ;;  %v561_v9 = vsel %vm459_vm0, %v559_v34, %v560_v40 }
  0xb5   : > { %v2009_v21 = vsel %vm459_vm0, %v665_v26, %v667_v27  ;;  %v661_v10 = vsel %vm459_vm0, %v659_v37, %v660_v16  ;;  %v864_v1 = vrot.slane %v834_v52, 2  ;;  %v664_v6 = vrot.slane %v636_v2, 1 }
  0xb6   : > { %v2016_v45 = vsel %vm459_vm0, %v660_v16, %v662_v32 }
  0xb7   : > { %v2011_v39 = vpop.permute.xlu2 %424  ;;  %v866_v27 = vsel %vm759_vm1, %v864_v1, %v865_v22  ;;  %v666_v16 = vsel %vm459_vm0, %v664_v6, %v665_v26  ;;  %v286_v1 = vmul.f32 %v1916_v63, %v1959_v25 }
  0xb8   : > { %v2013_v43 = vpop.permute.xlu1 %810  ;;  %v2019_v55 = vpop.permute.xlu0 %522 }
  0xb9   : > { %v534_v7 = vmul.f32 %v2019_v55, %v1907_v59  ;;  %v2027_v8 = vmul.f32 %v2019_v55, %v1986_v0  ;;  %v825_v29 = vmul.f32 %v2013_v43, %v1864_v36  ;;  %v2054_v28 = vmul.f32 %v2013_v43, %v1867_v38 }
  0xbb   : > { %974 = vrot.lane.b32.xlu2 %v956_v5, %s1670_s9  ;;  %577 = vrot.lane.b32.xlu1 %v561_v9, %s1669_s8  ;;  %v564_v35 = vrot.slane %v534_v7, 1  ;;  %v2702_v13 = vrot.slane %v2027_v8, 1  ;;  %v849_v37 = vrot.slane %v825_v29, 2  ;;  %v2703_v52 = vrot.slane %v2054_v28, 2 }
  0xbc   : > { %678 = vrot.lane.b32.xlu0 %v661_v10, %s1670_s9 }
  0xbd   : > { %v566_v22 = vsel %vm459_vm0, %v564_v35, %v2702_v13  ;;  %v851_v63 = vsel %vm759_vm1, %v849_v37, %v2703_v52  ;;  %v530_v37 = vmul.f32 %v1886_v46, %v1927_v4 }
  0xbf   : > { %v2035_v14 = vpop.permute.xlu2 %432 }
  0xc0   : > { %v2039_v15 = vmul.f32 %v2035_v14, %v1986_v0  ;;  %v446_v40 = vmul.f32 %v2035_v14, %v1980_v56  ;;  %v2043_v17 = vpop.permute.xlu1 %818  ;;  %v2045_v23 = vpop.permute.xlu0 %627 }
  0xc1   : > { %v639_v32 = vmul.f32 %v2045_v23, %v1907_v59  ;;  %v2060_v34 = vmul.f32 %v2045_v23, %v1986_v0  ;;  %v831_v35 = vmul.f32 %v2043_v17, %v1912_v61 }
  0xc2   : > { %v2701_v30 = vrot.slane %v2039_v15, 1  ;;  %v478_v31 = vrot.slane %v446_v40, 1  ;;  %v2091_v40 = vmul.f32 %v2043_v17, %v1959_v25 }
  0xc3   : > { %881 = vrot.lane.b32.xlu2 %v866_v27, %s1669_s8  ;;  %682 = vrot.lane.b32.xlu1 %v666_v16, %s1670_s9  ;;  %v669_v2 = vrot.slane %v639_v32, 1  ;;  %v2704_v5 = vrot.slane %v2060_v34, 1  ;;  %v859_v16 = vrot.slane %v831_v35, 2 }
  0xc4   : > { %581 = vrot.lane.b32.xlu0 %v566_v22, %s1669_s8  ;;  %v2071_v26 = vsel %vm459_vm0, %v2701_v30, %v478_v31  ;;  %v2706_v32 = vrot.slane %v2091_v40, 2 }
  0xc5   : > { %2713 = vst [vmem:[#allocation6_spill] sm:$0xff] %v2071_v26  ;;  %v671_v31 = vsel %vm459_vm0, %v669_v2, %v2704_v5  ;;  %v363_v2 = vmul.f32 %v1967_v33, %v1959_v25 }
  0xc6   : > { %v861_v46 = vsel %vm759_vm1, %v859_v16, %v2706_v32 }
  0xc7   : > { %v2075_v7 = vpop.permute.xlu2 %728 }
  0xc8   : > { %2714 = vst [vmem:[#allocation7_spill] sm:$0xff] %v2075_v7  ;;  %v2079_v9 = vmul.f32 %v2075_v7, %v1947_v20  ;;  %v2081_v10 = vpop.permute.xlu1 %923  ;;  %v2085_v6 = vpop.permute.xlu0 %919 }
  0xc9   : > { %v933_v27 = vmul.f32 %v2085_v6, %v1873_v41  ;;  %v2097_v29 = vmul.f32 %v2085_v6, %v1924_v3 }
  0xca   : > { %2715 = vst [vmem:[#allocation8_spill] sm:$0xff] %v2079_v9 }
  0xcb   : > { %307 = vrot.lane.b32.xlu2 %v286_v1, %s1669_s8  ;;  %869 = vrot.lane.b32.xlu1 %v851_v63, %s1669_s8  ;;  %v959_v22 = vrot.slane %v933_v27, 2  ;;  %v2707_v30 = vrot.slane %v2097_v29, 2  ;;  %v936_v27 = vmul.f32 %v2081_v10, %v1912_v61 }
  0xcc   : > { %686 = vrot.lane.b32.xlu0 %v671_v31, %s1670_s9  ;;  %v2128_v31 = vmul.f32 %v2081_v10, %v1959_v25 }
  0xcd   : > { %v961_v33 = vsel %vm759_vm1, %v959_v22, %v2707_v30  ;;  %v557_v22 = vrot.slane %v530_v37, 1 }
  0xce   : > { %v965_v32 = vrot.slane %v2128_v31, 2 }
  0xd0   : > { %v2110_v13 = vpop.permute.xlu1 %420  ;;  %v2122_v63 = vpop.permute.xlu0 %927 }
  0xd1   : > { %v2118_v1 = vmul.f32 %v2110_v13, %v1867_v38  ;;  %v437_v35 = vmul.f32 %v2110_v13, %v1893_v49  ;;  %v939_v50 = vmul.f32 %v2122_v63, %v1907_v59  ;;  %v2141_v9 = vmul.f32 %v2122_v63, %v1986_v0 }
  0xd3   : > { %v2710_v52 = vrot.slane %v2118_v1, 1  ;;  %v463_v5 = vrot.slane %v437_v35, 1  ;;  %384 = vrot.lane.b32.xlu2 %v363_v2, %s1670_s9  ;;  %877 = vrot.lane.b32.xlu1 %v861_v46, %s1669_s8  ;;  %v964_v35 = vrot.slane %v936_v27, 2  ;;  %v969_v30 = vrot.slane %v939_v50, 2 }
  0xd4   : > { %978 = vrot.lane.b32.xlu0 %v961_v33, %s1670_s9  ;;  %v970_v26 = vrot.slane %v2141_v9, 2  ;;  %v2716_v33 = vrot.slane %v1956_v24, 1 }
  0xd5   : > { %v2149_v16 = vsel %vm459_vm0, %v2710_v52, %v463_v5  ;;  %v966_v37 = vsel %vm759_vm1, %v964_v35, %v965_v32 }
  0xd6   : > { %v558_v5 = vsel %vm459_vm0, %v2716_v33, %v557_v22  ;;  %v971_v50 = vsel %vm759_vm1, %v969_v30, %v970_v26  ;;  %v284_v22 = vmul.f32 %v1876_v42, %v1924_v3  ;;  %v359_v30 = vmul.f32 %v1881_v44, %v1867_v38  ;;  %v2196_v44 = vpop.permute.xlu2 %297 }
  0xd8   : > { %v2153_v7 = vpop.permute.xlu0 %428 }
  0xd9   : > { %v2157_v2 = vmul.f32 %v2153_v7, %v1959_v25  ;;  %v443_v46 = vmul.f32 %v2153_v7, %v1947_v20 }
  0xdb   : > { %575 = vrot.lane.b32.xlu2 %v558_v5, %s1669_s8  ;;  %v471_v9 = vrot.slane %v2157_v2, 1  ;;  %v473_v27 = vrot.slane %v443_v46, 1  ;;  %982 = vrot.lane.b32.xlu1 %v966_v37, %s1670_s9  ;;  %v536_v46 = vmul.f32 %v2019_v55, %v1980_v56 }
  0xdc   : > { %986 = vrot.lane.b32.xlu0 %v971_v50, %s1670_s9 }
  0xdd   : > { %v2175_v24 = vsel %vm459_vm0, %v471_v9, %v473_v27  ;;  %v567_v55 = vrot.slane %v536_v46, 1  ;;  %v237_v27 = vmul.f32 %v1890_v48, %v1867_v38  ;;  %v2717_v46 = vrot.slane %v2027_v8, 1 }
  0xe0   : > { %v2179_v35 = vpop.permute.xlu0 %720 }
  0xe1   : > { %v2187_v33 = vmul.f32 %v2179_v35, %v1867_v38  ;;  %v737_v5 = vmul.f32 %v2179_v35, %v1893_v49  ;;  %v2219_v38 = vpop.permute.xlu2 %374 }
  0xe3   : > { %676 = vrot.lane.b32.xlu2 %v1902_v57, %s1670_s9  ;;  %v761_v42 = vrot.slane %v2187_v33, 2  ;;  %v763_v37 = vrot.slane %v737_v5, 2  ;;  %303 = vrot.lane.b32.xlu1 %v284_v22, %s1669_s8  ;;  %v288_v57 = vmul.f32 %v1909_v60, %v1986_v0  ;;  %v361_v22 = vmul.f32 %v1933_v11, %v1924_v3 }
  0xe4   : > { %376 = vrot.lane.b32.xlu0 %v359_v30, %s1670_s9  ;;  %v641_v30 = vmul.f32 %v2045_v23, %v1980_v56  ;;  %v365_v11 = vmul.f32 %v1904_v58, %v1986_v0  ;;  %v935_v23 = vmul.f32 %v2085_v6, %v1927_v4  ;;  %v941_v58 = vmul.f32 %v2122_v63, %v1980_v56 }
  0xe5   : > { %v2201_v50 = vsel %vm759_vm1, %v761_v42, %v763_v37  ;;  %v568_v37 = vsel %vm459_vm0, %v2717_v46, %v567_v55  ;;  %v2720_v46 = vrot.slane %v2054_v28, 2 }
  0xe6   : > { %v672_v60 = vrot.slane %v641_v30, 1 }
  0xe8   : > { %v300_v52 = vpop.permute.xlu0 %299 }
  0xe9   : > { %v2211_v5 = vadd.f32 %v300_v52, %v237_v27  ;;  %v2718_v52 = vrot.slane %v2060_v34, 1  ;;  %v962_v27 = vrot.slane %v935_v23, 2  ;;  %v827_v34 = vmul.f32 %v2013_v43, %v1893_v49  ;;  %v2260_v43 = vpop.permute.xlu1 %724 }
  0xeb   : > { %583 = vrot.lane.b32.xlu2 %v568_v37, %s1669_s8  ;;  %380 = vrot.lane.b32.xlu1 %v361_v22, %s1670_s9  ;;  %v673_v8 = vsel %vm459_vm0, %v2718_v52, %v672_v60  ;;  %v972_v22 = vrot.slane %v941_v58, 2  ;;  %v852_v30 = vrot.slane %v827_v34, 2  ;;  %v938_v60 = vmul.f32 %v2081_v10, %v1947_v20 }
  0xec   : > { %311 = vrot.lane.b32.xlu0 %v288_v57, %s1669_s8  ;;  %v2719_v57 = vrot.slane %v2097_v29, 2  ;;  %v833_v29 = vmul.f32 %v2043_v17, %v1947_v20  ;;  %v240_v58 = vmul.f32 %v1888_v47, %v1912_v61 }
  0xed   : > { %v973_v63 = vsel %vm759_vm1, %v970_v26, %v972_v22  ;;  %v853_v49 = vsel %vm759_vm1, %v2720_v46, %v852_v30  ;;  %v241_v46 = vmul.f32 %v1888_v47, %v1959_v25  ;;  %v2315_v47 = vmul.f32 %v2011_v39, %v1924_v3 }
  0xee   : > { %v963_v6 = vsel %vm759_vm1, %v2719_v57, %v962_v27  ;;  %v862_v28 = vrot.slane %v833_v29, 2 }
  0xf1   : > { %v302_v52 = vpop.permute.xlu1 %301 }
  0xf3   : > { %688 = vrot.lane.b32.xlu2 %v673_v8, %s1670_s9  ;;  %571 = vrot.lane.b32.xlu1 %v1944_v19, %s1669_s8  ;;  %v967_v8 = vrot.slane %v938_v60, 2 }
  0xf4   : > { %388 = vrot.lane.b32.xlu0 %v365_v11, %s1670_s9  ;;  %v2721_v11 = vrot.slane %v2091_v40, 2 }
  0xf5   : > { %v2232_v55 = vpop.permute.xlu2 %309  ;;  %v968_v27 = vsel %vm759_vm1, %v965_v32, %v967_v8  ;;  %v438_v8 = vmul.f32 %v2011_v39, %v1873_v41 }
  0xf6   : > { %v863_v23 = vsel %vm759_vm1, %v2721_v11, %v862_v28 }
  0xfb   : > { %980 = vrot.lane.b32.xlu2 %v963_v6, %s1670_s9  ;;  %579 = vrot.lane.b32.xlu1 %v1983_v62, %s1669_s8 }
  0xfc   : > { %680 = vrot.lane.b32.xlu0 %v2016_v45, %s1670_s9 }
  0xfd   : > { %v2246_v19 = vpop.permute.xlu2 %674 }
 0x103   : > { %988 = vrot.lane.b32.xlu2 %v973_v63, %s1670_s9  ;;  %684 = vrot.lane.b32.xlu1 %v2009_v21, %s1670_s9 }
 0x104   : > { %871 = vrot.lane.b32.xlu0 %v853_v49, %s1669_s8  ;;  %v236_v49 = vmul.f32 %v1890_v48, %v1864_v36  ;;  %v238_v48 = vmul.f32 %v1899_v54, %v1873_v41 }
 0x105   : > { %v2258_v62 = vpop.permute.xlu2 %732 }
 0x106   : > { %v2264_v45 = vmul.f32 %v2258_v62, %v1986_v0  ;;  %v746_v17 = vmul.f32 %v2258_v62, %v1980_v56  ;;  %v321_v28 = vadd.f32 %v2196_v44, %v236_v49  ;;  %v2722_v44 = vrot.slane %v2118_v1, 1 }
 0x107   : > { %v444_v1 = vmul.f32 %v2035_v14, %v1907_v59 }
 0x108   : > { %v776_v26 = vrot.slane %v2264_v45, 2  ;;  %v778_v37 = vrot.slane %v746_v17, 2 }
 0x10a   : > { %v2272_v21 = vsel %vm759_vm1, %v776_v26, %v778_v37 }
 0x10b   : > { %875 = vrot.lane.b32.xlu1 %v1941_v18, %s1669_s8  ;;  %v441_v18 = vmul.f32 %v2153_v7, %v1912_v61 }
 0x10c   : > { %879 = vrot.lane.b32.xlu0 %v863_v23, %s1669_s8  ;;  %v398_v23 = vadd.f32 %v2219_v38, %v321_v28  ;;  %v465_v38 = vrot.slane %v438_v8, 1 }
 0x10d   : > { %v2282_v56 = vpop.permute.xlu2 %873  ;;  %v306_v10 = vpop.permute.xlu1 %305  ;;  %v470_v57 = vrot.slane %v441_v18, 1 }
 0x10e   : > { %v325_v32 = vadd.f32 %v306_v10, %v240_v58  ;;  %v323_v10 = vadd.f32 %v302_v52, %v238_v48  ;;  %v466_v58 = vrot.slane %v2315_v47, 1  ;;  %v738_v52 = vmul.f32 %v2260_v43, %v1873_v41 }
 0x10f   : > { %v472_v22 = vsel %vm459_vm0, %v470_v57, %v471_v9  ;;  %v735_v57 = vmul.f32 %v2179_v35, %v1864_v36 }
 0x110   : > { %v765_v14 = vrot.slane %v738_v52, 2 }
 0x113   : > { %976 = vrot.lane.b32.xlu1 %v1977_v51, %s1670_s9 }
 0x114   : > { %984 = vrot.lane.b32.xlu0 %v968_v27, %s1670_s9 }
 0x115   : > { %v2290_v20 = vpop.permute.xlu2 %974  ;;  %v379_v40 = vpop.permute.xlu0 %378 }
 0x11b   : > { %883 = vrot.lane.b32.xlu1 %v2006_v12, %s1669_s8  ;;  %v435_v12 = vmul.f32 %v2110_v13, %v1864_v36  ;;  %v467_v36 = vsel %vm459_vm0, %v465_v38, %v466_v58  ;;  %s1514_s8 = sshll.u32 %s1724_s19, 4 }
 0x11c   : > { %s1403_s11 = scalar_lea.hbm %s2700_s4, %s1514_s8 }
 0x11d   : > { %v2298_v31 = vpop.permute.xlu2 %881  ;;  %v383_v51 = vpop.permute.xlu1 %382  ;;  %v460_v2 = vrot.slane %v435_v12, 1  ;;  %v475_v12 = vrot.slane %v444_v1, 1 }
 0x11e   : > { %v387_v6 = vpop.permute.xlu0 %386  ;;  %v402_v34 = vadd.f32 %v383_v51, %v325_v32  ;;  %v400_v32 = vadd.f32 %v379_v40, %v323_v10 }
 0x11f   : > { %v462_v27 = vsel %vm459_vm0, %v460_v2, %v2722_v44 }
 0x120   : > { %v492_v30 = vadd.f32 %v472_v22, %v402_v34  ;;  %v488_v18 = vadd.f32 %v462_v27, %v398_v23  ;;  %v242_v22 = vmul.f32 %v1897_v53, %v1907_v59  ;;  %v490_v35 = vadd.f32 %v467_v36, %v400_v32 }
 0x125   : > { %v308_v63 = vpop.permute.xlu2 %307  ;;  %v574_v7 = vpop.permute.xlu1 %573 }
 0x126   : > { %v570_v29 = vpop.permute.xlu0 %569  ;;  %v326_v17 = vadd.f32 %v308_v63, %v241_v46  ;;  %v2336_v63 = vmul.f32 %v2260_v43, %v1924_v3  ;;  %v760_v46 = vrot.slane %v735_v57, 2  ;;  %v595_v49 = vadd.f32 %v574_v7, %v490_v35 }
 0x127   : > { %v593_v51 = vadd.f32 %v570_v29, %v488_v18  ;;  %v327_v29 = vadd.f32 %v2232_v55, %v242_v22 }
 0x128   : > { %v762_v28 = vsel %vm759_vm1, %v760_v46, %v761_v42 }
 0x129   : > { %v698_v40 = vadd.f32 %v2246_v19, %v593_v51  ;;  %v404_v41 = vadd.f32 %v387_v6, %v327_v29  ;;  %v2723_v19 = vrot.slane %v2039_v15, 1 }
 0x12b   : > { %v788_v2 = vadd.f32 %v762_v28, %v698_v40  ;;  %v477_v55 = vsel %vm459_vm0, %v475_v12, %v2723_v19 }
 0x12c   : > { %v494_v48 = vadd.f32 %v477_v55, %v404_v41 }
 0x12d   : > { %v385_v37 = vpop.permute.xlu2 %384  ;;  %v578_v60 = vpop.permute.xlu1 %577 }
 0x12e   : > { %v679_v9 = vpop.permute.xlu0 %678  ;;  %v403_v11 = vadd.f32 %v385_v37, %v326_v17  ;;  %v766_v17 = vrot.slane %v2336_v63, 2  ;;  %v597_v10 = vadd.f32 %v578_v60, %v492_v30 }
 0x12f   : > { %v700_v37 = vadd.f32 %v679_v9, %v595_v49  ;;  %v2724_v9 = vld [vmem:[#allocation7_spill] sm:$0xff] }
 0x130   : > { %v2318_v13 = vadd.f32 %v2175_v24, %v403_v11  ;;  %v744_v11 = vmul.f32 %v2258_v62, %v1907_v59  ;;  %v767_v6 = vsel %vm759_vm1, %v765_v14, %v766_v17  ;;  %v741_v44 = vmul.f32 %v2724_v9, %v1912_v61 }
 0x131   : > { %v790_v33 = vadd.f32 %v767_v6, %v700_v37  ;;  %v2362_v59 = vmul.f32 %v2724_v9, %v1959_v25 }
 0x132   : > { %v775_v15 = vrot.slane %v744_v11, 2  ;;  %v770_v38 = vrot.slane %v741_v44, 2 }
 0x133   : > { %v895_v18 = vadd.f32 %v2282_v56, %v790_v33  ;;  %v771_v57 = vrot.slane %v2362_v59, 2 }
 0x135   : > { %v683_v34 = vpop.permute.xlu1 %682  ;;  %v772_v52 = vsel %vm759_vm1, %v770_v38, %v771_v57  ;;  %v2396_v41 = vpop.permute.xlu2 %575 }
 0x136   : > { %v582_v24 = vpop.permute.xlu0 %581  ;;  %v702_v25 = vadd.f32 %v683_v34, %v597_v10 }
 0x137   : > { %v599_v62 = vadd.f32 %v582_v24, %v494_v48 }
 0x138   : > { %v792_v36 = vadd.f32 %v772_v52, %v702_v25 }
 0x13d   : > { %v870_v23 = vpop.permute.xlu1 %869 }
 0x13e   : > { %v687_v8 = vpop.permute.xlu0 %686  ;;  %v893_v7 = vadd.f32 %v870_v23, %v788_v2 }
 0x13f   : > { %v704_v27 = vadd.f32 %v687_v8, %v599_v62 }
 0x140   : > { %v2356_v42 = vadd.f32 %v2290_v20, %v893_v7  ;;  %v777_v20 = vsel %vm759_vm1, %v775_v15, %v776_v26 }
 0x141   : > { %v794_v22 = vadd.f32 %v777_v20, %v704_v27 }
 0x142   : > { %1070 = vst.sshfl [vmem:[#allocation1] sm:$0xff pattern:$0x75316420] %v2356_v42  ;;  %v1028_v24 = vrot.slane %v2356_v42, 1  ;;  %v1042_v30 = vrot.slane %v2356_v42, 2  ;;  %v1056_v56 = vrot.slane %v2356_v42, 3 }
 0x143   : > { %v899_v37 = vadd.f32 %v2298_v31, %v794_v22 }
 0x145   : > { %v878_v61 = vpop.permute.xlu1 %877 }
 0x146   : > { %v979_v32 = vpop.permute.xlu0 %978  ;;  %v897_v28 = vadd.f32 %v878_v61, %v792_v36 }
 0x147   : > { %v2370_v51 = vadd.f32 %v979_v32, %v895_v18 }
 0x149   : > { %1073 = vst.sshfl [vmem:[#allocation1 + $0x10] sm:$0xff pattern:$0x75316420] %v2370_v51  ;;  %v1043_v45 = vrot.slane %v2370_v51, 1  ;;  %v1029_v26 = vsel %vm1011_vm2, %v2370_v51, %v1028_v24  ;;  %v1057_v60 = vrot.slane %v2370_v51, 2  ;;  %v1010_v34 = vrot.slane %v2370_v51, 7 }
 0x14a   : > { %v2381_v1 = vld [vmem:[#allocation1 + $0x1] ss:$2 sm:$0xff]  ;;  %v1030_v46 = vsel %vm1013_vm3, %v2370_v51, %v1029_v26 }
 0x14b   : > { %1096 = vst.sshfl [vmem:[#allocation1] sm:$0xff pattern:$0x75316420] %v2356_v42  ;;  %v1044_v35 = vsel %vm1011_vm2, %v1043_v45, %v1042_v30  ;;  %v1058_v40 = vsel %vm1011_vm2, %v1057_v60, %v1056_v56  ;;  %v1012_v29 = vsel %vm1011_vm2, %v1010_v34, %v2356_v42 }
 0x14c   : > { %v1045_v12 = vsel %vm1013_vm3, %v1043_v45, %v1044_v35  ;;  %v1059_v49 = vsel %vm1013_vm3, %v1057_v60, %v1058_v40  ;;  %v1014_v14 = vsel %vm1013_vm3, %v1010_v34, %v1012_v29  ;;  %v440_v60 = vmul.f32 %v2011_v39, %v1927_v4  ;;  %v677_v34 = vpop.permute.xlu2 %676 }
 0x14d   : > { %v983_v2 = vpop.permute.xlu1 %982  ;;  %v239_v39 = vmul.f32 %v1899_v54, %v1924_v3 }
 0x14e   : > { %v987_v11 = vpop.permute.xlu0 %986  ;;  %v2399_v23 = vadd.f32 %v983_v2, %v897_v28 }
 0x14f   : > { %v2401_v8 = vadd.f32 %v987_v11, %v899_v37 }
 0x150   : > { %v2403_v19 = vld [vmem:[#allocation1 + $0x11] ss:$2 sm:$0xff]  ;;  %v1046_v55 = vsel %vm1016_vm4, %v2399_v23, %v1045_v12  ;;  %v1031_v31 = vrot.slane %v2399_v23, 7  ;;  %1076 = vst.sshfl [vmem:[#allocation1 + $0x20] sm:$0xff pattern:$0x75316420] %v2399_v23 }
 0x151   : > { %1099 = vst.sshfl [vmem:[#allocation1 + $0x10] sm:$0xff pattern:$0x75316420] %v2370_v51  ;;  %v1048_v7 = vrot.slane %v2401_v8, 7  ;;  %v1047_v6 = vsel %vm1018_vm5, %v2399_v23, %v1046_v55  ;;  %v1060_v33 = vrot.slane %v2399_v23, 1  ;;  %v1034_v15 = vrot.slane %v2401_v8, 6 }
 0x152   : > { %v2413_v48 = vld [vmem:[#allocation1 + $0x1] ss:$2 sm:$0xff]  ;;  %1079 = vst.sshfl [vmem:[#allocation1 + $0x30] sm:$0xff pattern:$0x75316420] %v2401_v8  ;;  %v1032_v44 = vsel %vm1016_vm4, %v1031_v31, %v1030_v46  ;;  %v1015_v18 = vrot.slane %v2399_v23, 6 }
 0x153   : > { %v1049_v9 = vsel %vm1021_vm6, %v1048_v7, %v1047_v6  ;;  %v1033_v27 = vsel %vm1018_vm5, %v1031_v31, %v1032_v44  ;;  %1122 = vst.sshfl [vmem:[#allocation1] sm:$0xff pattern:$0x75316420] %v2356_v42  ;;  %v1061_v10 = vsel %vm1016_vm4, %v1060_v33, %v1059_v49  ;;  %v1020_v22 = vrot.slane %v2401_v8, 5 }
 0x154   : > { %v1050_v62 = vsel %vm1023_vm7, %v1048_v7, %v1049_v9  ;;  %v1035_v38 = vsel %vm1021_vm6, %v1034_v15, %v1033_v27  ;;  %v1062_v20 = vsel %vm1018_vm5, %v1060_v33, %v1061_v10  ;;  %v1017_v30 = vsel %vm1016_vm4, %v1015_v18, %v1014_v14  ;;  %v584_v11 = vpop.permute.xlu2 %583 }
 0x155   : > { %1051 = vrot.lane.b32.xlu2 %v1050_v62, %s1671_s12  ;;  %v304_v61 = vpop.permute.xlu1 %303  ;;  %v1036_v25 = vsel %vm1023_vm7, %v1034_v15, %v1035_v38  ;;  %v1063_v24 = vsel %vm1021_vm6, %v2401_v8, %v1062_v20  ;;  %v1019_v26 = vsel %vm1018_vm5, %v1015_v18, %v1017_v30  ;;  %v468_v12 = vrot.slane %v440_v60, 1 }
 0x156   : > { %v377_v32 = vpop.permute.xlu0 %376  ;;  %1037 = vrot.lane.b32.xlu0 %v1036_v25, %s1672_s13  ;;  %v2437_v45 = vsel %vm1023_vm7, %v2401_v8, %v1063_v24  ;;  %v1022_v46 = vsel %vm1021_vm6, %v1020_v22, %v1019_v26  ;;  %v740_v33 = vmul.f32 %v2260_v43, %v1927_v4  ;;  %v2726_v25 = vld [vmem:[#allocation8_spill] sm:$0xff] }
 0x157   : > { %v399_v56 = vadd.f32 %v377_v32, %v2211_v5  ;;  %v2446_v5 = vld [vmem:[#allocation1 + $0x21] ss:$2 sm:$0xff]  ;;  %v1024_v35 = vsel %vm1023_vm7, %v1020_v22, %v1022_v46  ;;  %v469_v37 = vsel %vm459_vm0, %v466_v58, %v468_v12  ;;  %v773_v24 = vrot.slane %v2726_v25, 2 }
 0x158   : > { %v2442_v52 = vld [vmem:[#allocation1 + $0x11] ss:$2 sm:$0xff]  ;;  %1102 = vst.sshfl [vmem:[#allocation1 + $0x20] sm:$0xff pattern:$0x75316420] %v2399_v23  ;;  %v768_v27 = vrot.slane %v740_v33, 2 }
 0x159   : > { %v489_v36 = vadd.f32 %v2149_v16, %v399_v56  ;;  %1125 = vst.sshfl [vmem:[#allocation1 + $0x10] sm:$0xff pattern:$0x75316420] %v2370_v51  ;;  %v2450_v40 = vld [vmem:[#allocation1 + $0x31] ss:$2 sm:$0xff]  ;;  %v324_v16 = vadd.f32 %v304_v61, %v239_v39  ;;  %v1082_v39 = vrot.slane %v2403_v19, 7 }
 0x15a   : > { %1105 = vst.sshfl [vmem:[#allocation1 + $0x30] sm:$0xff pattern:$0x75316420] %v2401_v8  ;;  %v2456_v29 = vld [vmem:[#allocation1 + $0x1] ss:$2 sm:$0xff]  ;;  %v769_v32 = vsel %vm759_vm1, %v766_v17, %v768_v27  ;;  %vm1344_vm0 = vcmask 1043456  }
 0x15b   : > { %1148 = vst.sshfl [vmem:[#allocation1] sm:$0xff pattern:$0x75316420] %v2356_v42  ;;  %v243_v42 = vmul.f32 %v1897_v53, %v1986_v0 }
 0x15c   : > { %1027 = vst.msk [vmem:[#allocation2] sm:$0xf] %vm1026_vm8, %v1024_v35  ;;  %v689_v10 = vpop.permute.xlu2 %688 }
 0x15d   : > { %v381_v49 = vpop.permute.xlu1 %380 }
 0x15e   : > { %v312_v14 = vpop.permute.xlu0 %311  ;;  %v401_v28 = vadd.f32 %v381_v49, %v324_v16  ;;  %v1108_v16 = vrot.slane %v2413_v48, 1 }
 0x15f   : > { %v2465_v3 = vld [vmem:[#allocation1 + $0x21] ss:$2 sm:$0xff]  ;;  %v328_v47 = vadd.f32 %v312_v14, %v243_v42 }
 0x160   : > { %v2463_v2 = vld [vmem:[#allocation1 + $0x11] ss:$2 sm:$0xff]  ;;  %v491_v54 = vadd.f32 %v469_v37, %v401_v28  ;;  %1128 = vst.sshfl [vmem:[#allocation1 + $0x20] sm:$0xff pattern:$0x75316420] %v2399_v23  ;;  %v1111_v25 = vrot.slane %v2465_v3, 7 }
 0x161   : > { %1151 = vst.sshfl [vmem:[#allocation1 + $0x10] sm:$0xff pattern:$0x75316420] %v2370_v51  ;;  %v2468_v55 = vld [vmem:[#allocation1 + $0x31] ss:$2 sm:$0xff] }
 0x162   : > { %1131 = vst.sshfl [vmem:[#allocation1 + $0x30] sm:$0xff pattern:$0x75316420] %v2401_v8  ;;  %v2725_v51 = vld [vmem:[#allocation6_spill] sm:$0xff]  ;;  %v596_v18 = vadd.f32 %v2396_v41, %v491_v54  ;;  %v774_v41 = vsel %vm759_vm1, %v771_v57, %v773_v24  ;;  %v2506_v49 = vld [vmem:[#allocation1 + $0x1] ss:$2 sm:$0xff] }
 0x163   : > { %vm1340_vm1 = vcmask 31744  }
 0x165   : > { %v572_v7 = vpop.permute.xlu1 %571 }
 0x166   : > { %v389_v58 = vpop.permute.xlu0 %388  ;;  %v594_v31 = vadd.f32 %v572_v7, %v489_v36 }
 0x167   : > { %v405_v6 = vadd.f32 %v389_v58, %v328_v47  ;;  %v2477_v15 = vld [vmem:[#allocation1 + $0x21] ss:$2 sm:$0xff]  ;;  %v1083_v47 = vsel %vm1011_vm2, %v1082_v39, %v2381_v1 }
 0x168   : > { %v699_v9 = vadd.f32 %v677_v34, %v594_v31  ;;  %1154 = vst.sshfl [vmem:[#allocation1 + $0x20] sm:$0xff pattern:$0x75316420] %v2399_v23  ;;  %v981_v34 = vpop.permute.xlu2 %980  ;;  %v2496_v17 = vld [vmem:[#allocation1 + $0x11] ss:$2 sm:$0xff] }
 0x169   : > { %v495_v44 = vadd.f32 %v2725_v51, %v405_v6  ;;  %v2479_v62 = vld [vmem:[#allocation1 + $0x31] ss:$2 sm:$0xff] }
 0x16a   : > { %v789_v0 = vadd.f32 %v2201_v50, %v699_v9  ;;  %1157 = vst.sshfl [vmem:[#allocation1 + $0x30] sm:$0xff pattern:$0x75316420] %v2401_v8 }
 0x16b   : > { %v600_v53 = vadd.f32 %v584_v11, %v495_v44 }
 0x16d   : > { %v705_v38 = vadd.f32 %v689_v10, %v600_v53  ;;  %v580_v4 = vpop.permute.xlu1 %579  ;;  %v1109_v10 = vsel %vm1011_vm2, %v2442_v52, %v1108_v16 }
 0x16e   : > { %v681_v43 = vpop.permute.xlu0 %680  ;;  %v598_v50 = vadd.f32 %v580_v4, %v2318_v13 }
 0x16f   : > { %v701_v20 = vadd.f32 %v681_v43, %v596_v18  ;;  %v795_v61 = vadd.f32 %v2272_v21, %v705_v38  ;;  %v2513_v11 = vld [vmem:[#allocation1 + $0x21] ss:$2 sm:$0xff] }
 0x171   : > { %v791_v23 = vadd.f32 %v769_v32, %v701_v20 }
 0x175   : > { %v685_v8 = vpop.permute.xlu1 %684 }
 0x176   : > { %v872_v22 = vpop.permute.xlu0 %871  ;;  %v703_v30 = vadd.f32 %v685_v8, %v598_v50  ;;  %v989_v50 = vpop.permute.xlu2 %988  ;;  %v1085_v8 = vrot.slane %v2446_v5, 6 }
 0x177   : > { %v894_v46 = vadd.f32 %v872_v22, %v789_v0 }
 0x178   : > { %v793_v56 = vadd.f32 %v774_v41, %v703_v30  ;;  %v2552_v30 = vld [vmem:[#allocation1 + $0x31] ss:$2 sm:$0xff] }
 0x17d   : > { %v876_v26 = vpop.permute.xlu1 %875 }
 0x17e   : > { %v880_v60 = vpop.permute.xlu0 %879  ;;  %v896_v21 = vadd.f32 %v876_v26, %v791_v23 }
 0x17f   : > { %v898_v13 = vadd.f32 %v880_v60, %v793_v56  ;;  %v1110_v56 = vsel %vm1013_vm3, %v2442_v52, %v1109_v10 }
 0x180   : > { %v2494_v63 = vadd.f32 %v981_v34, %v896_v21  ;;  %v1112_v21 = vsel %vm1016_vm4, %v1111_v25, %v1110_v56 }
 0x182   : > { %1231 = vst.sshfl [vmem:[#allocation1 + $0x10] sm:$0xff pattern:$0x75316420] %v2494_v63  ;;  %v1216_v12 = vrot.slane %v2494_v63, 2  ;;  %v1178_v14 = vrot.slane %v2494_v63, 7  ;;  %v1203_v19 = vrot.slane %v2494_v63, 1 }
 0x185   : > { %v977_v36 = vpop.permute.xlu1 %976 }
 0x186   : > { %v985_v35 = vpop.permute.xlu0 %984  ;;  %v2500_v59 = vadd.f32 %v977_v36, %v894_v46 }
 0x187   : > { %v2502_v57 = vadd.f32 %v985_v35, %v898_v13  ;;  %v1135_v35 = vrot.slane %v2463_v2, 1 }
 0x188   : > { %v1215_v28 = vrot.slane %v2500_v59, 3  ;;  %v1189_v54 = vrot.slane %v2500_v59, 1  ;;  %v1202_v42 = vrot.slane %v2500_v59, 2  ;;  %1228 = vst.sshfl [vmem:[#allocation1] sm:$0xff pattern:$0x75316420] %v2500_v59  ;;  %v1179_v7 = vsel %vm1011_vm2, %v1178_v14, %v2500_v59 }
 0x189   : > { %v1219_v37 = vrot.slane %v2502_v57, 1  ;;  %v2519_v48 = vld [vmem:[#allocation1 + $0x11] ss:$2 sm:$0xff]  ;;  %v1192_v6 = vrot.slane %v2502_v57, 7  ;;  %v1180_v33 = vsel %vm1013_vm3, %v1178_v14, %v1179_v7  ;;  %v1181_v44 = vrot.slane %v2502_v57, 6 }
 0x18a   : > { %v1217_v58 = vsel %vm1011_vm2, %v1216_v12, %v1215_v28  ;;  %v1190_v31 = vsel %vm1011_vm2, %v2494_v63, %v1189_v54  ;;  %1234 = vst.sshfl [vmem:[#allocation1 + $0x20] sm:$0xff pattern:$0x75316420] %v2502_v57  ;;  %v1204_v51 = vsel %vm1011_vm2, %v1203_v19, %v1202_v42  ;;  %v1113_v14 = vsel %vm1018_vm5, %v1111_v25, %v1112_v21 }
 0x18b   : > { %v1218_v1 = vsel %vm1013_vm3, %v1216_v12, %v1217_v58  ;;  %v1191_v9 = vsel %vm1013_vm3, %v2494_v63, %v1190_v31  ;;  %1256 = vst.sshfl [vmem:[#allocation1 + $0x10] sm:$0xff pattern:$0x75316420] %v2494_v63  ;;  %v1205_v27 = vsel %vm1013_vm3, %v1203_v19, %v1204_v51  ;;  %v1182_v20 = vsel %vm1016_vm4, %v1181_v44, %v1180_v33 }
 0x18c   : > { %v1220_v53 = vsel %vm1016_vm4, %v1219_v37, %v1218_v1  ;;  %v1193_v0 = vsel %vm1016_vm4, %v1192_v6, %v1191_v9  ;;  %v1206_v43 = vsel %vm1016_vm4, %v2502_v57, %v1205_v27  ;;  %v1183_v24 = vsel %vm1018_vm5, %v1181_v44, %v1182_v20 }
 0x18d   : > { %v884_v18 = vpop.permute.xlu1 %883  ;;  %v1221_v38 = vsel %vm1018_vm5, %v1219_v37, %v1220_v53  ;;  %v1194_v4 = vsel %vm1018_vm5, %v1192_v6, %v1193_v0  ;;  %v1207_v23 = vsel %vm1018_vm5, %v2502_v57, %v1206_v43  ;;  %v1114_v28 = vrot.slane %v2468_v55, 6 }
 0x18e   : > { %v900_v32 = vadd.f32 %v884_v18, %v795_v61  ;;  %v1084_v61 = vsel %vm1013_vm3, %v1082_v39, %v1083_v47  ;;  %v1134_v37 = vrot.slane %v2456_v29, 2  ;;  %v1088_v47 = vrot.slane %v2450_v40, 5 }
 0x18f   : > { %v2554_v41 = vld [vmem:[#allocation1 + $0x1] ss:$2 sm:$0xff]  ;;  %v1086_v34 = vsel %vm1016_vm4, %v1085_v8, %v1084_v61  ;;  %v1115_v42 = vsel %vm1021_vm6, %v1114_v28, %v1113_v14  ;;  %v1161_v0 = vrot.slane %v2496_v17, 2  ;;  %v1140_v27 = vrot.slane %v2479_v62, 7 }
 0x190   : > { %v2550_v22 = vadd.f32 %v989_v50, %v900_v32  ;;  %1253 = vst.sshfl [vmem:[#allocation1] sm:$0xff pattern:$0x75316420] %v2500_v59  ;;  %v1087_v54 = vsel %vm1018_vm5, %v1085_v8, %v1086_v34  ;;  %v1136_v7 = vsel %vm1011_vm2, %v1135_v35, %v1134_v37  ;;  %v1116_v33 = vsel %vm1023_vm7, %v1114_v28, %v1115_v42 }
 0x191   : > { %v2559_v26 = vld [vmem:[#allocation1 + $0x21] ss:$2 sm:$0xff]  ;;  %v1089_v29 = vsel %vm1021_vm6, %v1088_v47, %v1087_v54  ;;  %v1137_v1 = vsel %vm1013_vm3, %v1135_v35, %v1136_v7  ;;  %v1240_v18 = vrot.slane %v2519_v48, 7 }
 0x192   : > { %v1222_v3 = vsel %vm1021_vm6, %v2550_v22, %v1221_v38  ;;  %v1195_v5 = vrot.slane %v2550_v22, 6  ;;  %v1208_v60 = vrot.slane %v2550_v22, 7  ;;  %1237 = vst.sshfl [vmem:[#allocation1 + $0x30] sm:$0xff pattern:$0x75316420] %v2550_v22  ;;  %v1184_v39 = vrot.slane %v2550_v22, 5 }
 0x193   : > { %v1223_v52 = vsel %vm1023_vm7, %v2550_v22, %v1222_v3  ;;  %1259 = vst.sshfl [vmem:[#allocation1 + $0x20] sm:$0xff pattern:$0x75316420] %v2502_v57  ;;  %v1258_v46 = vld [vmem:[#allocation1 + $0x11] ss:$2 sm:$0xff]  ;;  %v1138_v51 = vsel %vm1016_vm4, %v2477_v15, %v1137_v1  ;;  %v1090_v44 = vsel %vm1023_vm7, %v1088_v47, %v1089_v29  ;;  %v1160_v38 = vrot.slane %v2506_v49, 3 }
 0x194   : > { %1224 = vrot.lane.b32.xlu2 %v1223_v52, %s1673_s14  ;;  %v1196_v13 = vsel %vm1021_vm6, %v1195_v5, %v1194_v4  ;;  %v1209_v36 = vsel %vm1021_vm6, %v1208_v60, %v1207_v23  ;;  %1281 = vst.sshfl [vmem:[#allocation1 + $0x10] sm:$0xff pattern:$0x75316420] %v2494_v63  ;;  %v1185_v2 = vsel %vm1021_vm6, %v1184_v39, %v1183_v24  ;;  %v1164_v4 = vrot.slane %v2513_v11, 1 }
 0x195   : > { %v1197_v12 = vsel %vm1023_vm7, %v1195_v5, %v1196_v13  ;;  %v1210_v16 = vsel %vm1023_vm7, %v1208_v60, %v1209_v36  ;;  %v1186_v19 = vsel %vm1023_vm7, %v1184_v39, %v1185_v2  ;;  %v1243_v43 = vrot.slane %v2559_v26, 6 }
 0x196   : > { %1198 = vrot.lane.b32.xlu1 %v1197_v12, %s1672_s13  ;;  %1211 = vrot.lane.b32.xlu0 %v1210_v16, %s1671_s12  ;;  %1188 = vst.msk [vmem:[#allocation2 + $0x4] sm:$0xf] %vm1026_vm8, %v1186_v19  ;;  %v1162_v48 = vsel %vm1011_vm2, %v1161_v0, %v1160_v38  ;;  %s190_s12 = scalar_lea.vmem [#allocation3], %s1471_s7 }
 0x197   : > { %v1255_v58 = vld [vmem:[#allocation1 + $0x1] ss:$2 sm:$0xff]  ;;  %s1405_s13 = sshll.u32 %s190_s12, 4  ;;  %s1406_s13 = int_to_ptr.vmem [resolvable:$true] %s1405_s13 }
 0x198   : > { %v1265_v55 = vrot.slane %v1255_v58, 1  ;;  %1278 = vst.sshfl [vmem:[#allocation1] sm:$0xff pattern:$0x75316420] %v2500_v59 }
 0x199   : > { %v2592_v31 = vld [vmem:[#allocation1 + $0x31] ss:$2 sm:$0xff] }
 0x19a   : > { %1262 = vst.sshfl [vmem:[#allocation1 + $0x30] sm:$0xff pattern:$0x75316420] %v2550_v22  ;;  %v1261_v6 = vld [vmem:[#allocation1 + $0x21] ss:$2 sm:$0xff]  ;;  %v1266_v40 = vsel %vm1011_vm2, %v1258_v46, %v1265_v55 }
 0x19b   : > { %1284 = vst.sshfl [vmem:[#allocation1 + $0x20] sm:$0xff pattern:$0x75316420] %v2502_v57  ;;  %v1283_v9 = vld [vmem:[#allocation1 + $0x11] ss:$2 sm:$0xff]  ;;  %v1267_v53 = vsel %vm1013_vm3, %v1258_v46, %v1266_v40  ;;  %v1268_v10 = vrot.slane %v1261_v6, 7 }
 0x19c   : > { %1117 = vrot.lane.b32.xlu2 %v1116_v33, %s1674_s20  ;;  %1306 = vst.sshfl [vmem:[#allocation1 + $0x10] sm:$0xff pattern:$0x75316420] %v2494_v63  ;;  %v1139_v63 = vsel %vm1018_vm5, %v2477_v15, %v1138_v51  ;;  %v1291_v32 = vrot.slane %v1283_v9, 1  ;;  %v1330_v55 = vld [vmem:[%s2699_s3] sm:$0xff] }
 0x19d   : > { %v1269_v17 = vsel %vm1016_vm4, %v1268_v10, %v1267_v53  ;;  %v1141_v15 = vsel %vm1021_vm6, %v1140_v27, %v1139_v63 }
 0x19e   : > { %1065 = vrot.lane.b32.xlu1 %v2437_v45, %s1673_s14  ;;  %1091 = vrot.lane.b32.xlu0 %v1090_v44, %s1675_s22  ;;  %v1241_v45 = vsel %vm1011_vm2, %v1240_v18, %v2554_v41  ;;  %v1270_v25 = vsel %vm1018_vm5, %v1268_v10, %v1269_v17  ;;  %v1142_v41 = vsel %vm1023_vm7, %v1140_v27, %v1141_v15  ;;  %s1407_s14 = sshll.u32 %s1403_s11, 4  ;;  %s1408_s14 = int_to_ptr.hbm [resolvable:$true] %s1407_s14 }
 0x19f   : > { %v1280_v20 = vld [vmem:[#allocation1 + $0x1] ss:$2 sm:$0xff]  ;;  %v1242_v24 = vsel %vm1013_vm3, %v1240_v18, %v1241_v45 }
 0x1a0   : > { %v1290_v23 = vrot.slane %v1280_v20, 2  ;;  %1303 = vst.sshfl [vmem:[#allocation1] sm:$0xff pattern:$0x75316420] %v2500_v59  ;;  %v1163_v59 = vsel %vm1013_vm3, %v1161_v0, %v1162_v48  ;;  %v1244_v3 = vsel %vm1016_vm4, %v1243_v43, %v1242_v24 }
 0x1a1   : > { %v1264_v62 = vld [vmem:[#allocation1 + $0x31] ss:$2 sm:$0xff]  ;;  %v1165_v26 = vsel %vm1016_vm4, %v1164_v4, %v1163_v59  ;;  %v1245_v34 = vsel %vm1018_vm5, %v1243_v43, %v1244_v3 }
 0x1a2   : > { %v1271_v49 = vrot.slane %v1264_v62, 6  ;;  %1287 = vst.sshfl [vmem:[#allocation1 + $0x30] sm:$0xff pattern:$0x75316420] %v2550_v22  ;;  %v1286_v11 = vld [vmem:[#allocation1 + $0x21] ss:$2 sm:$0xff]  ;;  %v1292_v50 = vsel %vm1011_vm2, %v1291_v32, %v1290_v23  ;;  %v1166_v21 = vsel %vm1018_vm5, %v1164_v4, %v1165_v26 }
 0x1a3   : > { %1309 = vst.sshfl [vmem:[#allocation1 + $0x20] sm:$0xff pattern:$0x75316420] %v2502_v57  ;;  %v1293_v61 = vsel %vm1013_vm3, %v1291_v32, %v1292_v50  ;;  %v1246_v57 = vrot.slane %v2592_v31, 5  ;;  %v1308_v5 = vld [vmem:[#allocation1 + $0x11] ss:$2 sm:$0xff]  ;;  %v1167_v14 = vsel %vm1021_vm6, %v2552_v30, %v1166_v21 }
 0x1a4   : > { %v1272_v8 = vsel %vm1021_vm6, %v1271_v49, %v1270_v25  ;;  %v1294_v60 = vsel %vm1016_vm4, %v1286_v11, %v1293_v61  ;;  %v1316_v36 = vrot.slane %v1308_v5, 2  ;;  %v1328_v4 = vld [vmem:[%s2698_s2] sm:$0xff] }
 0x1a5   : > { %v1273_v56 = vsel %vm1023_vm7, %v1271_v49, %v1272_v8  ;;  %v1247_v35 = vsel %vm1021_vm6, %v1246_v57, %v1245_v34  ;;  %v1295_v16 = vsel %vm1018_vm5, %v1286_v11, %v1294_v60 }
 0x1a6   : > { %1143 = vrot.lane.b32.xlu1 %v1142_v41, %s1676_s23  ;;  %1274 = vrot.lane.b32.xlu0 %v1273_v56, %s1674_s20  ;;  %v1248_v19 = vsel %vm1023_vm7, %v1246_v57, %v1247_v35  ;;  %s1392_s20 = scalar_lea.sflag [#allocation4], %s188_s6 }
 0x1a7   : > { %v1305_v52 = vld [vmem:[#allocation1 + $0x1] ss:$2 sm:$0xff] }
 0x1a8   : > { %v1315_v13 = vrot.slane %v1305_v52, 3 }
 0x1a9   : > { %v1289_v46 = vld [vmem:[#allocation1 + $0x31] ss:$2 sm:$0xff] }
 0x1aa   : > { %v1296_v39 = vrot.slane %v1289_v46, 7  ;;  %1312 = vst.sshfl [vmem:[#allocation1 + $0x30] sm:$0xff pattern:$0x75316420] %v2550_v22  ;;  %v1311_v12 = vld [vmem:[#allocation1 + $0x21] ss:$2 sm:$0xff]  ;;  %v1317_v28 = vsel %vm1011_vm2, %v1316_v36, %v1315_v13  ;;  %v1168_v22 = vsel %vm1023_vm7, %v2552_v30, %v1167_v14 }
 0x1ab   : > { %v1318_v2 = vsel %vm1013_vm3, %v1316_v36, %v1317_v28  ;;  %v1319_v54 = vrot.slane %v1311_v12, 1 }
 0x1ac   : > { %v1297_v37 = vsel %vm1021_vm6, %v1296_v39, %v1295_v16 }
 0x1ad   : > { %v1298_v42 = vsel %vm1023_vm7, %v1296_v39, %v1297_v37  ;;  %v1320_v47 = vsel %vm1016_vm4, %v1319_v54, %v1318_v2 }
 0x1ae   : > { %1249 = vrot.lane.b32.xlu1 %v1248_v19, %s1675_s22  ;;  %1299 = vrot.lane.b32.xlu2 %v1298_v42, %s1676_s23  ;;  %v1321_v58 = vsel %vm1018_vm5, %v1319_v54, %v1320_v47  ;;  %s1618_s22 = sshra.s32 %s1408_s14, 4  ;;  %s1619_s22 = int_to_ptr.hbm [resolvable:$true] %s1618_s22 }
 0x1af   : > { %1169 = vrot.lane.b32.xlu0 %v1168_v22, %s1677_s27  ;;  %v1052_v6 = vpop.permute.xlu2 %1051  ;;  %s1620_s19 = scalar_lea.hbm %s1619_s22, 16  ;;  %p1625_p0 = scmp.lt.s32.totalorder %s1619_s22, %s2700_s4 }
 0x1b0   : > { %p1621_p11 = scmp.ne.s32.totalorder %s1619_s22, %s1620_s19  ;;  %p1626_p1 = scmp.lt.s32.totalorder %s1624_s28, %s1620_s19 }
 0x1b1   : > { %v1314_v7 = vld [vmem:[#allocation1 + $0x31] ss:$2 sm:$0xff] }
 0x1b2   : > { %v1322_v31 = vsel %vm1021_vm6, %v1314_v7, %v1321_v58  ;;  %p1622_p12 = pnand %p1621_p11, %p1741_p5  ;;  %p1627_p2 = por %p1626_p1, %p1625_p0 }
 0x1b3   : > { %v1323_v29 = vsel %vm1023_vm7, %v1314_v7, %v1322_v31 }
 0x1b4   : > { %p1623_p13 = pneg %p1622_p12 }
 0x1b6   : > { %1324 = vrot.lane.b32.xlu1 %v1323_v29, %s1677_s27  ;;  %1333 = vperm.xlu2 %1567, %v1330_v55   ;;  %p1628_p3 = pnand %p1627_p2, %p1623_p13 }
 0x1c8   : > { %v1038_v30 = vpop.permute.xlu0 %1037 }
 0x1c9   : > { %1041 = vst.msk [vmem:[#allocation2] sm:$0xf] %vm1040_vm9, %v1038_v30 }
 0x1ca   : > { %1055 = vst.msk [vmem:[#allocation2] sm:$0xf] %vm1054_vm10, %v1052_v6 }
 0x1ee   : > { %v1225_v33 = vpop.permute.xlu2 %1224 }
 0x1f6   : > { %v1118_v44 = vpop.permute.xlu2 %1117 }
 0x208   : > { %v1199_v1 = vpop.permute.xlu1 %1198  ;;  %v1212_v40 = vpop.permute.xlu0 %1211 }
 0x209   : > { %1201 = vst.msk [vmem:[#allocation2 + $0x4] sm:$0xf] %vm1040_vm9, %v1199_v1  ;;  %v1300_v18 = vpop.permute.xlu2 %1299 }
 0x20a   : > { %1214 = vst.msk [vmem:[#allocation2 + $0x4] sm:$0xf] %vm1054_vm10, %v1212_v40 }
 0x20b   : > { %1227 = vst.msk [vmem:[#allocation2 + $0x4] sm:$0xf] %vm1068_vm11, %v1225_v33 }
 0x210   : > { %v1066_v9 = vpop.permute.xlu1 %1065  ;;  %v1092_v51 = vpop.permute.xlu0 %1091 }
 0x211   : > { %1069 = vst.msk [vmem:[#allocation2] sm:$0xf] %vm1068_vm11, %v1066_v9  ;;  %v1334_v43 = vpop.permute.xlu2 %1333 }
 0x212   : > { %1095 = vst.msk [vmem:[#allocation2] sm:$0xf] %vm1094_vm12, %v1092_v51 }
 0x213   : > { %1121 = vst.msk [vmem:[#allocation2] sm:$0xf] %vm1120_vm13, %v1118_v44 }
 0x218   : > { %v1144_v53 = vpop.permute.xlu1 %1143  ;;  %v1275_v0 = vpop.permute.xlu0 %1274 }
 0x219   : > { %1147 = vst.msk [vmem:[#allocation2] sm:$0xf] %vm1146_vm14, %v1144_v53 }
 0x220   : > { %v1250_v27 = vpop.permute.xlu1 %1249 }
 0x221   : > { %1252 = vst.msk [vmem:[#allocation2 + $0x4] sm:$0xf] %vm1094_vm12, %v1250_v27  ;;  %v1170_v10 = vpop.permute.xlu0 %1169 }
 0x222   : > { %1277 = vst.msk [vmem:[#allocation2 + $0x4] sm:$0xf] %vm1120_vm13, %v1275_v0 }
 0x223   : > { %1302 = vst.msk [vmem:[#allocation2 + $0x4] sm:$0xf] %vm1146_vm14, %v1300_v18 }
 0x224   : > { %1173 = vst.msk [vmem:[#allocation2] sm:$0xf] %vm1172_vm15, %v1170_v10 }
 0x228   : > { %v1325_v63 = vpop.permute.xlu1 %1324 }
 0x229   : > { %1327 = vst.msk [vmem:[#allocation2 + $0x4] sm:$0xf] %vm1172_vm15, %v1325_v63 }
 0x230   : > { %v1329_v38 = vld [vmem:[#allocation2] sm:$0xff] }
 0x231   : > { %1337 = vst [vmem:[#allocation1] ss:$2 sm:$0xff] %v1329_v38 }
 0x238   : > { %v1338_v17 = vld.sshfl [vmem:[#allocation1] sm:$0xff pattern:$0x75316420]  ;;  %v1339_v45 = vld.sshfl [vmem:[#allocation1 + $0x8] sm:$0xff pattern:$0x75316420] }
 0x239   : > { %1505 = vmatpush.msk.msra.mxu0 %vm1344_vm0, %v1338_v17  ;;  %1507 = vmatpush.msk.msra.mxu1 %vm1344_vm0, %v1339_v45 }
 0x23a   : > { %1506 = vmatmul.msk.f32.vlgmr.msra.gmra.mxu0 %vm1340_vm1, %v1328_v4  ;;  %1508 = vmatmul.msk.f32.vlgmr.msra.gmra.mxu1 %vm1340_vm1, %v1328_v4 }
 0x2b7   : > { %v1366_v20 = vpop.f32.mrf.mxu0  ;;  %v1386_v32 = vpop.f32.mrf.mxu1 }
 0x2b8   : > { %v1367_v62 = vadd.f32 %v1366_v20, %v1334_v43  ;;  %v1387_v23 = vadd.f32 %v1386_v32, %v1334_v43 }
 0x2ba   : > { %1389 = vst [vmem:[%s190_s12] sm:$0xff] %v1367_v62 }
 0x2bb   : > { %1390 = vst [vmem:[%s190_s12 + $0x8] sm:$0xff] %v1387_v23 }
 0x2bc   : > { %1631 = shalt.err (!%p1628_p3)
}
 0x2bd   : > { %1516 = dma.vmem_to_hbm [thread:$0]  (%p1741_p5), %s1406_s13, 256, %s1408_s14, %s1392_s20  }
 0x2be PF: > { %p1522_p4 = scmp.ge.s32.totalorder %s1666_s18, 2  ;;  %s1419_s5 = sand.u32 1, %s1654_s15  }
 0x2bf   : > { %s1420_s6 = scalar_lea.sflag [#allocation4], %s1419_s5 }
 0x2c0   : > { %p1519_p7 = pnand %p1522_p4, %p1745_p6 }
 0x2c2   : > { %p1520_p8 = pneg %p1519_p7 }
 0x2c4   : > { %1649 = dma.done.wait (%p1520_p8), %s1420_s6, 256  }
 0x2c5   : > { %1651 = vsyncadd (%p1520_p8), %s1420_s6, 4294967040  ;;  %p14_p9 = scmp.ge.s32.totalorder %s1728_s21, 4   ;;  %s2727_s15 = smov %s1658_s16 }
 0x2c6   : > { %s2728_s16 = smov %s1662_s17  ;;  %s2729_s17 = smov %s1739_s24 }
 0x2c7   : > { %s2730_s18 = smov %s1728_s21  ;;  %16 = sbr.rel (!%p14_p9) target bundleno = 3 (0x3), region = 111 }
 0x2cc   :  { %1426 = vsyncpa [#allocation4], 1 }
 0x2cd   :  { %1428 = vsyncpa [#allocation4 + $0x1], 1 }

</bundles_post_ra>
